<compile_context>
chip_gen: v7x
topology: tpu7x:2x2x1
jax: 0.10.0
libtpu: 0.0.40
codegen_flags: <defaults>
</compile_context>

<pallas_src>
import functools

import jax
import jax.numpy as jnp
from jax.experimental import pallas as pl
from jax.experimental.pallas import tpu as pltpu

D_IN, D_H, D_Z = 784, 400, 20


def vae_kernel(x_ref, eps_ref,
               w1_ref, b1_ref,
               w2_ref, b2_ref,          # fused fc21|fc22: (400, 40), (1, 40)
               w3_ref, b3_ref,
               w4_ref, b4_ref,
               recon_ref, mulv_ref):
    # encode
    x = x_ref[...].astype(jnp.bfloat16)                        # (TB, 784)
    h1 = jnp.dot(x, w1_ref[...], preferred_element_type=jnp.float32) + b1_ref[...]
    h1 = jnp.maximum(h1, 0.0)                                  # ReLU, (TB, 400)

    mulv = jnp.dot(h1.astype(jnp.bfloat16), w2_ref[...],
                   preferred_element_type=jnp.float32) + b2_ref[...]   # (TB, 40)
    mu = mulv[:, :D_Z]
    logvar = mulv[:, D_Z:]

    # reparameterize
    std = jnp.exp(0.5 * logvar)
    z = mu + eps_ref[...] * std                                # (TB, 20)

    # decode
    h3 = jnp.dot(z.astype(jnp.bfloat16), w3_ref[...],
                 preferred_element_type=jnp.float32) + b3_ref[...]
    h3 = jnp.maximum(h3, 0.0)                                  # (TB, 400)
    logits = jnp.dot(h3.astype(jnp.bfloat16), w4_ref[...],
                     preferred_element_type=jnp.float32) + b4_ref[...]

    recon_ref[...] = jax.nn.sigmoid(logits)                    # (TB, 784)
    mulv_ref[...] = mulv                                       # (TB, 40) = [mu | logvar]


def _round_up(n, m):
    return ((n + m - 1) // m) * m


def _pinned_spec(shape):
    # whole-array block, same block index every grid step -> stays VMEM-resident
    return pl.BlockSpec(shape, lambda i: tuple(0 for _ in shape))


@functools.partial(jax.jit, static_argnames=("tb",))
def vae_forward(x, eps, params, *, tb=256):
    """x: (B, 1, 28, 28) or (B, 784); eps: (B, 20). Returns (recon, mu, logvar)."""
    B = x.shape[0]
    x2 = x.reshape(B, D_IN).astype(jnp.float32)                # glue: x.view(-1, 784)

    # choose batch tile: 256 (MXU-filling) for big batches, padded-B for small ones
    TB = tb if B >= tb else _round_up(B, 8)
    Bp = _round_up(B, TB)
    if Bp != B:
        x2 = jnp.pad(x2, ((0, Bp - B), (0, 0)))
        eps_p = jnp.pad(eps, ((0, Bp - B), (0, 0)))
    else:
        eps_p = eps
    grid = (Bp // TB,)

    weights = [
        params["w1"], params["b1"],
        params["w2"], params["b2"],
        params["w3"], params["b3"],
        params["w4"], params["b4"],
    ]
    in_specs = [
        pl.BlockSpec((TB, D_IN), lambda i: (i, 0)),            # x: batch-tiled
        pl.BlockSpec((TB, D_Z), lambda i: (i, 0)),             # eps: batch-tiled
    ] + [_pinned_spec(w.shape) for w in weights]               # weights: resident

    out_shape = (
        jax.ShapeDtypeStruct((Bp, D_IN), jnp.float32),         # recon
        jax.ShapeDtypeStruct((Bp, 2 * D_Z), jnp.float32),      # [mu | logvar]
    )
    out_specs = (
        pl.BlockSpec((TB, D_IN), lambda i: (i, 0)),
        pl.BlockSpec((TB, 2 * D_Z), lambda i: (i, 0)),
    )

    flops = 2 * Bp * (D_IN * D_H + D_H * 2 * D_Z + D_Z * D_H + D_H * D_IN)
    weight_bytes = sum(w.size * w.dtype.itemsize for w in weights)
    act_bytes = Bp * (D_IN + D_Z + 2 * D_Z + D_IN) * 4
    cost = pl.CostEstimate(
        flops=flops,
        transcendentals=Bp * (D_Z + D_IN),                     # exp(std) + sigmoid
        bytes_accessed=weight_bytes + act_bytes,
    )

    recon, mulv = pl.pallas_call(
        vae_kernel,
        out_shape=out_shape,
        grid=grid,
        in_specs=in_specs,
        out_specs=out_specs,
        compiler_params=pltpu.CompilerParams(
            dimension_semantics=("parallel",),                 # batch tiles independent
            vmem_limit_bytes=16 << 20,
        ),
        cost_estimate=cost,
    )(x2, eps_p, *weights)

    recon = recon[:B]
    mu = mulv[:B, :D_Z]
    logvar = mulv[:B, D_Z:]
    return recon, mu, logvar


def init_params(key):
    """PyTorch-Linear-style init U(-1/sqrt(fan_in), +1/sqrt(fan_in)).
    Weights stored as (in_features, out_features) in bfloat16; biases (1, out) f32.
    fc21/fc22 are concatenated along the output dim into w2/b2."""
    def linear(k, fan_in, fan_out):
        kw, kb = jax.random.split(k)
        bound = 1.0 / jnp.sqrt(fan_in)
        w = jax.random.uniform(kw, (fan_in, fan_out), jnp.float32, -bound, bound)
        b = jax.random.uniform(kb, (1, fan_out), jnp.float32, -bound, bound)
        return w.astype(jnp.bfloat16), b

    k1, k21, k22, k3, k4 = jax.random.split(key, 5)
    p = {}
    p["w1"], p["b1"] = linear(k1, D_IN, D_H)
    w21, b21 = linear(k21, D_H, D_Z)
    w22, b22 = linear(k22, D_H, D_Z)
    p["w2"] = jnp.concatenate([w21, w22], axis=1)              # (400, 40)
    p["b2"] = jnp.concatenate([b21, b22], axis=1)              # (1, 40)
    p["w3"], p["b3"] = linear(k3, D_Z, D_H)
    p["w4"], p["b4"] = linear(k4, D_H, D_IN)
    return p


def vae_forward_ref(x, eps, p):
    """Pure-JAX reference using the same bf16-weight / f32-accumulate math."""
    B = x.shape[0]
    x2 = x.reshape(B, D_IN).astype(jnp.float32)

    def mm(a, w, b):
        return jnp.dot(a.astype(jnp.bfloat16), w,
                       preferred_element_type=jnp.float32) + b

    h1 = jnp.maximum(mm(x2, p["w1"], p["b1"]), 0.0)
    mulv = mm(h1, p["w2"], p["b2"])
    mu, logvar = mulv[:, :D_Z], mulv[:, D_Z:]
    z = mu + eps * jnp.exp(0.5 * logvar)
    h3 = jnp.maximum(mm(z, p["w3"], p["b3"]), 0.0)
    recon = jax.nn.sigmoid(mm(h3, p["w4"], p["b4"]))
    return recon, mu, logvar


def _check(B, params, key):
    kx, keps = jax.random.split(key)
    x = jax.random.normal(kx, (B, 1, 28, 28), jnp.float32)
    eps = jax.random.normal(keps, (B, D_Z), jnp.float32)
    recon, mu, logvar = jax.block_until_ready(vae_forward(x, eps, params))
    r_ref, mu_ref, lv_ref = vae_forward_ref(x, eps, params)
    assert recon.shape == (B, D_IN) and mu.shape == (B, D_Z) and logvar.shape == (B, D_Z)
    assert jnp.allclose(recon, r_ref, atol=5e-3, rtol=5e-3)
    assert jnp.allclose(mu, mu_ref, atol=5e-3, rtol=5e-3)
    assert jnp.allclose(logvar, lv_ref, atol=5e-3, rtol=5e-3)


if __name__ == "__main__":
    key = jax.random.PRNGKey(0)
    kp, k_small, k_big = jax.random.split(key, 3)
    params = init_params(kp)

    # small-batch sanity check (single tile, grid=(1,))
    _check(8, params, k_small)
    # multi-tile path: B=300 -> padded to 512, TB=256, grid=(2,), weights resident
    _check(300, params, k_big)

    print("KERNEL_OK")
</pallas_src>

<mosaic_0001>
module attributes {stable_mosaic.version = 11 : i64} {
  func.func @vae_kernel(%arg0: i32, %arg1: memref<8x784xf32, #tpu.memory_space<vmem>>, %arg2: memref<8x20xf32, #tpu.memory_space<vmem>>, %arg3: memref<784x400xbf16, #tpu.memory_space<vmem>>, %arg4: memref<1x400xf32, #tpu.memory_space<vmem>>, %arg5: memref<400x40xbf16, #tpu.memory_space<vmem>>, %arg6: memref<1x40xf32, #tpu.memory_space<vmem>>, %arg7: memref<20x400xbf16, #tpu.memory_space<vmem>>, %arg8: memref<1x400xf32, #tpu.memory_space<vmem>>, %arg9: memref<400x784xbf16, #tpu.memory_space<vmem>>, %arg10: memref<1x784xf32, #tpu.memory_space<vmem>>, %arg11: memref<8x784xf32, #tpu.memory_space<vmem>>, %arg12: memref<8x40xf32, #tpu.memory_space<vmem>>) attributes {dimension_semantics = [#tpu.dimension_semantics<parallel>], iteration_bounds = array<i64: 1>, scalar_prefetch = 0 : i64, scratch_operands = 0 : i64, tpu.core_type = #tpu.core_type<tc>, window_params = [{transform_indices = @transform_0, window_bounds = array<i64: 8, 784>}, {transform_indices = @transform_1, window_bounds = array<i64: 8, 20>}, {pipeline_mode = #tpu.pipeline_mode<synchronous>, transform_indices = @transform_2, window_bounds = array<i64: 784, 400>}, {pipeline_mode = #tpu.pipeline_mode<synchronous>, transform_indices = @transform_3, window_bounds = array<i64: 1, 400>}, {pipeline_mode = #tpu.pipeline_mode<synchronous>, transform_indices = @transform_4, window_bounds = array<i64: 400, 40>}, {pipeline_mode = #tpu.pipeline_mode<synchronous>, transform_indices = @transform_5, window_bounds = array<i64: 1, 40>}, {pipeline_mode = #tpu.pipeline_mode<synchronous>, transform_indices = @transform_6, window_bounds = array<i64: 20, 400>}, {pipeline_mode = #tpu.pipeline_mode<synchronous>, transform_indices = @transform_7, window_bounds = array<i64: 1, 400>}, {pipeline_mode = #tpu.pipeline_mode<synchronous>, transform_indices = @transform_8, window_bounds = array<i64: 400, 784>}, {pipeline_mode = #tpu.pipeline_mode<synchronous>, transform_indices = @transform_9, window_bounds = array<i64: 1, 784>}, {transform_indices = @transform_10, window_bounds = array<i64: 8, 784>}, {transform_indices = @transform_11, window_bounds = array<i64: 8, 40>}]} {
    %c0 = arith.constant 0 : index
    %c0_0 = arith.constant 0 : index
    %0 = vector.load %arg1[%c0, %c0_0] : memref<8x784xf32, #tpu.memory_space<vmem>>, vector<8x784xf32>
    %1 = arith.truncf %0 : vector<8x784xf32> to vector<8x784xbf16>
    %c0_1 = arith.constant 0 : index
    %c0_2 = arith.constant 0 : index
    %2 = vector.load %arg3[%c0_1, %c0_2] : memref<784x400xbf16, #tpu.memory_space<vmem>>, vector<784x400xbf16>
    %cst = arith.constant dense<0.000000e+00> : vector<8x400xf32>
    %3 = tpu.matmul %1, %2, %cst {dimension_numbers = #tpu.dot_dimension_numbers<[1], [0], [0], [1], [0, 0, 1, 1], [], []>} : vector<8x784xbf16>, vector<784x400xbf16>, vector<8x400xf32> -> vector<8x400xf32>
    %c0_3 = arith.constant 0 : index
    %c0_4 = arith.constant 0 : index
    %4 = vector.load %arg4[%c0_3, %c0_4] : memref<1x400xf32, #tpu.memory_space<vmem>>, vector<1x400xf32>
    %5 = vector.broadcast %4 : vector<1x400xf32> to vector<8x400xf32>
    %6 = arith.addf %3, %5 : vector<8x400xf32>
    %cst_5 = arith.constant 0.000000e+00 : f32
    %7 = vector.broadcast %cst_5 : f32 to vector<8x400xf32>
    %8 = arith.maximumf %6, %7 : vector<8x400xf32>
    %9 = arith.truncf %8 : vector<8x400xf32> to vector<8x400xbf16>
    %c0_6 = arith.constant 0 : index
    %c0_7 = arith.constant 0 : index
    %10 = vector.load %arg5[%c0_6, %c0_7] : memref<400x40xbf16, #tpu.memory_space<vmem>>, vector<400x40xbf16>
    %cst_8 = arith.constant dense<0.000000e+00> : vector<8x40xf32>
    %11 = tpu.matmul %9, %10, %cst_8 {dimension_numbers = #tpu.dot_dimension_numbers<[1], [0], [0], [1], [0, 0, 1, 1], [], []>} : vector<8x400xbf16>, vector<400x40xbf16>, vector<8x40xf32> -> vector<8x40xf32>
    %c0_9 = arith.constant 0 : index
    %c0_10 = arith.constant 0 : index
    %12 = vector.load %arg6[%c0_9, %c0_10] : memref<1x40xf32, #tpu.memory_space<vmem>>, vector<1x40xf32>
    %13 = vector.broadcast %12 : vector<1x40xf32> to vector<8x40xf32>
    %14 = arith.addf %11, %13 : vector<8x40xf32>
    %15 = vector.extract_strided_slice %14 {offsets = [0, 0], sizes = [8, 20], strides = [1, 1]} : vector<8x40xf32> to vector<8x20xf32>
    %16 = vector.extract_strided_slice %14 {offsets = [0, 20], sizes = [8, 20], strides = [1, 1]} : vector<8x40xf32> to vector<8x20xf32>
    %cst_11 = arith.constant 5.000000e-01 : f32
    %17 = vector.broadcast %cst_11 : f32 to vector<8x20xf32>
    %18 = arith.mulf %17, %16 : vector<8x20xf32>
    %19 = math.exp %18 : vector<8x20xf32>
    %c0_12 = arith.constant 0 : index
    %c0_13 = arith.constant 0 : index
    %20 = vector.load %arg2[%c0_12, %c0_13] : memref<8x20xf32, #tpu.memory_space<vmem>>, vector<8x20xf32>
    %21 = arith.mulf %20, %19 : vector<8x20xf32>
    %22 = arith.addf %15, %21 : vector<8x20xf32>
    %23 = arith.truncf %22 : vector<8x20xf32> to vector<8x20xbf16>
    %c0_14 = arith.constant 0 : index
    %c0_15 = arith.constant 0 : index
    %24 = vector.load %arg7[%c0_14, %c0_15] : memref<20x400xbf16, #tpu.memory_space<vmem>>, vector<20x400xbf16>
    %cst_16 = arith.constant dense<0.000000e+00> : vector<8x400xf32>
    %25 = tpu.matmul %23, %24, %cst_16 {dimension_numbers = #tpu.dot_dimension_numbers<[1], [0], [0], [1], [0, 0, 1, 1], [], []>} : vector<8x20xbf16>, vector<20x400xbf16>, vector<8x400xf32> -> vector<8x400xf32>
    %c0_17 = arith.constant 0 : index
    %c0_18 = arith.constant 0 : index
    %26 = vector.load %arg8[%c0_17, %c0_18] : memref<1x400xf32, #tpu.memory_space<vmem>>, vector<1x400xf32>
    %27 = vector.broadcast %26 : vector<1x400xf32> to vector<8x400xf32>
    %28 = arith.addf %25, %27 : vector<8x400xf32>
    %cst_19 = arith.constant 0.000000e+00 : f32
    %29 = vector.broadcast %cst_19 : f32 to vector<8x400xf32>
    %30 = arith.maximumf %28, %29 : vector<8x400xf32>
    %31 = arith.truncf %30 : vector<8x400xf32> to vector<8x400xbf16>
    %c0_20 = arith.constant 0 : index
    %c0_21 = arith.constant 0 : index
    %32 = vector.load %arg9[%c0_20, %c0_21] : memref<400x784xbf16, #tpu.memory_space<vmem>>, vector<400x784xbf16>
    %cst_22 = arith.constant dense<0.000000e+00> : vector<8x784xf32>
    %33 = tpu.matmul %31, %32, %cst_22 {dimension_numbers = #tpu.dot_dimension_numbers<[1], [0], [0], [1], [0, 0, 1, 1], [], []>} : vector<8x400xbf16>, vector<400x784xbf16>, vector<8x784xf32> -> vector<8x784xf32>
    %c0_23 = arith.constant 0 : index
    %c0_24 = arith.constant 0 : index
    %34 = vector.load %arg10[%c0_23, %c0_24] : memref<1x784xf32, #tpu.memory_space<vmem>>, vector<1x784xf32>
    %35 = vector.broadcast %34 : vector<1x784xf32> to vector<8x784xf32>
    %36 = arith.addf %33, %35 : vector<8x784xf32>
    %37 = arith.negf %36 : vector<8x784xf32>
    %38 = math.exp %37 : vector<8x784xf32>
    %cst_25 = arith.constant 1.000000e+00 : f32
    %39 = vector.broadcast %cst_25 : f32 to vector<8x784xf32>
    %40 = arith.addf %39, %38 : vector<8x784xf32>
    %41 = arith.divf %39, %40 : vector<8x784xf32>
    %c0_26 = arith.constant 0 : index
    %c0_27 = arith.constant 0 : index
    %42 = vector.load %arg11[%c0_26, %c0_27] : memref<8x784xf32, #tpu.memory_space<vmem>>, vector<8x784xf32>
    tpu.vector_store %arg11[%c0_26, %c0_27], %41 {strides = array<i32>} : memref<8x784xf32, #tpu.memory_space<vmem>>, vector<8x784xf32>,
    %c0_28 = arith.constant 0 : index
    %c0_29 = arith.constant 0 : index
    %43 = vector.load %arg12[%c0_28, %c0_29] : memref<8x40xf32, #tpu.memory_space<vmem>>, vector<8x40xf32>
    tpu.vector_store %arg12[%c0_28, %c0_29], %14 {strides = array<i32>} : memref<8x40xf32, #tpu.memory_space<vmem>>, vector<8x40xf32>,
    return
  }
  func.func @transform_0(%arg0: i32) -> (i32, i32) {
    %c0_i32 = arith.constant 0 : i32
    %c0_i32_0 = arith.constant 0 : i32
    return %arg0, %c0_i32 : i32, i32
  }
  func.func @transform_1(%arg0: i32) -> (i32, i32) {
    %c0_i32 = arith.constant 0 : i32
    %c0_i32_0 = arith.constant 0 : i32
    return %arg0, %c0_i32 : i32, i32
  }
  func.func @transform_2(%arg0: i32) -> (i32, i32) {
    %c0_i32 = arith.constant 0 : i32
    %c0_i32_0 = arith.constant 0 : i32
    %c0_i32_1 = arith.constant 0 : i32
    return %c0_i32, %c0_i32_0 : i32, i32
  }
  func.func @transform_3(%arg0: i32) -> (i32, i32) {
    %c0_i32 = arith.constant 0 : i32
    %c0_i32_0 = arith.constant 0 : i32
    %c0_i32_1 = arith.constant 0 : i32
    return %c0_i32, %c0_i32_0 : i32, i32
  }
  func.func @transform_4(%arg0: i32) -> (i32, i32) {
    %c0_i32 = arith.constant 0 : i32
    %c0_i32_0 = arith.constant 0 : i32
    %c0_i32_1 = arith.constant 0 : i32
    return %c0_i32, %c0_i32_0 : i32, i32
  }
  func.func @transform_5(%arg0: i32) -> (i32, i32) {
    %c0_i32 = arith.constant 0 : i32
    %c0_i32_0 = arith.constant 0 : i32
    %c0_i32_1 = arith.constant 0 : i32
    return %c0_i32, %c0_i32_0 : i32, i32
  }
  func.func @transform_6(%arg0: i32) -> (i32, i32) {
    %c0_i32 = arith.constant 0 : i32
    %c0_i32_0 = arith.constant 0 : i32
    %c0_i32_1 = arith.constant 0 : i32
    return %c0_i32, %c0_i32_0 : i32, i32
  }
  func.func @transform_7(%arg0: i32) -> (i32, i32) {
    %c0_i32 = arith.constant 0 : i32
    %c0_i32_0 = arith.constant 0 : i32
    %c0_i32_1 = arith.constant 0 : i32
    return %c0_i32, %c0_i32_0 : i32, i32
  }
  func.func @transform_8(%arg0: i32) -> (i32, i32) {
    %c0_i32 = arith.constant 0 : i32
    %c0_i32_0 = arith.constant 0 : i32
    %c0_i32_1 = arith.constant 0 : i32
    return %c0_i32, %c0_i32_0 : i32, i32
  }
  func.func @transform_9(%arg0: i32) -> (i32, i32) {
    %c0_i32 = arith.constant 0 : i32
    %c0_i32_0 = arith.constant 0 : i32
    %c0_i32_1 = arith.constant 0 : i32
    return %c0_i32, %c0_i32_0 : i32, i32
  }
  func.func @transform_10(%arg0: i32) -> (i32, i32) {
    %c0_i32 = arith.constant 0 : i32
    %c0_i32_0 = arith.constant 0 : i32
    return %arg0, %c0_i32 : i32, i32
  }
  func.func @transform_11(%arg0: i32) -> (i32, i32) {
    %c0_i32 = arith.constant 0 : i32
    %c0_i32_0 = arith.constant 0 : i32
    return %arg0, %c0_i32 : i32, i32
  }
}

</mosaic_0001>

<bundles_post_ra>
// kernel: vae_forward.1
= control target key start
LH: loop header
LB: loop body
LE: loop exit
PB: predicated region body
PF: predicated region fallthrough
CT: control target
= control target key end

     0   :  { %v4739_v2 = vmov 0   ;;  %vm1251_vm0 = vcmask 130048   ;;  %s6173_s0 = inlined_call_operand.vmem [shape: f32[8,784], index: 0, kind: input, shape index: {}]   ;;  %s6174_s1 = inlined_call_operand.vmem [shape: f32[8,20], index: 1, kind: input, shape index: {}]   ;;  %s6175_s2 = inlined_call_operand.vmem [shape: bf16[784,400], index: 2, kind: input, shape index: {}]   ;;  %s6176_s3 = inlined_call_operand.vmem [shape: f32[1,400], index: 3, kind: input, shape index: {}]   ;;  %s6177_s4 = inlined_call_operand.vmem [shape: bf16[400,40], index: 4, kind: input, shape index: {}]   ;;  %s6178_s5 = inlined_call_operand.vmem [shape: f32[1,40], index: 5, kind: input, shape index: {}]   ;;  %s6179_s6 = inlined_call_operand.vmem [shape: bf16[20,400], index: 6, kind: input, shape index: {}]   ;;  %s6180_s7 = inlined_call_operand.vmem [shape: f32[1,400], index: 7, kind: input, shape index: {}]   ;;  %s6181_s8 = inlined_call_operand.vmem [shape: bf16[400,784], index: 8, kind: input, shape index: {}]   ;;  %s6182_s9 = inlined_call_operand.vmem [shape: f32[1,784], index: 9, kind: input, shape index: {}]   ;;  %s6183_s10 = inlined_call_operand.hbm [shape: f32[8,784], index: 10, kind: output, shape index: {0}]   ;;  %s6184_s11 = inlined_call_operand.vmem [shape: f32[8,40], index: 11, kind: output, shape index: {1}]  }
   0x1   :  { %v4106_v0 = vld [vmem:[%s6175_s2 + $0x4] ss:$16 sps:$4 sm:$0xff]   ;;  %1410 = vmatprep.mubr.bf16.mxu1 %v4739_v2  ;;  %v4110_v3 = vld [vmem:[%s6175_s2] ss:$16 sps:$4 sm:$0xff]   ;;  %v4114_v8 = vld [vmem:[%s6175_s2 + $0x8] ss:$16 sps:$4 sm:$0xff]  }
   0x2   :  { %v4108_v1 = vld [vmem:[%s6175_s2 + $0x604] ss:$16 sps:$4 sm:$0xff]   ;;  %1255 = vmatprep.subr.bf16.mxu0 %v4106_v0  ;;  %v4111_v4 = vld [vmem:[%s6175_s2 + $0x600] ss:$16 sps:$4 sm:$0xff]   ;;  %v4116_v9 = vld [vmem:[%s6175_s2 + $0xc] ss:$16 sps:$4 sm:$0xff]  }
   0x3   :  { %1378 = vmatprep.subr.bf16.mxu1 %v4108_v1  ;;  %v4112_v5 = vld [vmem:[%s6175_s2 + $0x24] ss:$16 sps:$4 sm:$0xff]   ;;  %1256 = vmatpush1.bf16.msra.mxu0 %v4110_v3  ;;  %v4117_v10 = vld [vmem:[%s6175_s2 + $0x20] ss:$16 sps:$4 sm:$0xff]   ;;  %v4120_v12 = vld [vmem:[%s6175_s2 + $0x28] ss:$16 sps:$4 sm:$0xff]  }
   0x4   :  { %v45_v6 = vld [vmem:[%s6173_s0 + $0x30] sm:$0xff]  ;;  %1379 = vmatpush1.bf16.msra.mxu1 %v4111_v4  ;;  %1257 = vmatprep.subr.bf16.mxu0 %v4112_v5  ;;  %v4122_v13 = vld [vmem:[%s6175_s2 + $0x2c] ss:$16 sps:$4 sm:$0xff]   ;;  %v4126_v17 = vld [vmem:[%s6175_s2 + $0x48] ss:$16 sps:$4 sm:$0xff]  }
   0x5   :  { %v4821_v7 = vpack.c.bf16 %v45_v6, %v45_v6  ;;  %v4118_v11 = vld [vmem:[%s6175_s2 + $0x44] ss:$16 sps:$4 sm:$0xff]   ;;  %1419 = vmatprep.subr.bf16.mxu1 %v4116_v9  ;;  %v4123_v14 = vld [vmem:[%s6175_s2 + $0x40] ss:$16 sps:$4 sm:$0xff]   ;;  %v4128_v16 = vld [vmem:[%s6175_s2 + $0x4c] ss:$16 sps:$4 sm:$0xff]  }
   0x6   :  { %v4124_v15 = vld [vmem:[%s6175_s2 + $0x64] ss:$16 sps:$4 sm:$0xff]   ;;  %v4129_v18 = vld [vmem:[%s6175_s2 + $0x60] ss:$16 sps:$4 sm:$0xff]   ;;  %v4134_v20 = vld [vmem:[%s6175_s2 + $0x6c] ss:$16 sps:$4 sm:$0xff]  }
   0x7   :  { %3788 = vmatmul.mubr.msk.bf16.vlgmr.msra.gmra.mrb[0].mxu1 %vm1251_vm0, %v4821_v7  ;;  %1258 = vmatpush1.bf16.msra.mxu0 %v4117_v10  ;;  %v4130_v19 = vld [vmem:[%s6175_s2 + $0x84] ss:$16 sps:$4 sm:$0xff]   ;;  %v4132_v21 = vld [vmem:[%s6175_s2 + $0x68] ss:$16 sps:$4 sm:$0xff]   ;;  %v4135_v22 = vld [vmem:[%s6175_s2 + $0x80] ss:$16 sps:$4 sm:$0xff]  }
   0x8   :  { %1420 = vmatpush1.bf16.msra.mxu1 %v4114_v8  ;;  %1259 = vmatprep.subr.bf16.mxu0 %v4118_v11  ;;  %v4136_v23 = vld [vmem:[%s6175_s2 + $0xa4] ss:$16 sps:$4 sm:$0xff]   ;;  %v4140_v24 = vld [vmem:[%s6175_s2 + $0x8c] ss:$16 sps:$4 sm:$0xff]   ;;  %v4138_v25 = vld [vmem:[%s6175_s2 + $0x88] ss:$16 sps:$4 sm:$0xff]  }
   0x9   :  { %1421 = vmatprep.subr.bf16.mxu1 %v4122_v13  ;;  %v4141_v26 = vld [vmem:[%s6175_s2 + $0xa0] ss:$16 sps:$4 sm:$0xff]   ;;  %v4142_v27 = vld [vmem:[%s6175_s2 + $0xc4] ss:$16 sps:$4 sm:$0xff]   ;;  %v4146_v28 = vld [vmem:[%s6175_s2 + $0xac] ss:$16 sps:$4 sm:$0xff]  }
   0xa   :  { %v4144_v29 = vld [vmem:[%s6175_s2 + $0xa8] ss:$16 sps:$4 sm:$0xff]   ;;  %v4147_v30 = vld [vmem:[%s6175_s2 + $0xc0] ss:$16 sps:$4 sm:$0xff]   ;;  %v4148_v31 = vld [vmem:[%s6175_s2 + $0xe4] ss:$16 sps:$4 sm:$0xff]  }
   0xb   :  { %1260 = vmatpush1.bf16.msra.mxu0 %v4123_v14  ;;  %v4152_v32 = vld [vmem:[%s6175_s2 + $0xcc] ss:$16 sps:$4 sm:$0xff]   ;;  %v4150_v33 = vld [vmem:[%s6175_s2 + $0xc8] ss:$16 sps:$4 sm:$0xff]   ;;  %v4153_v34 = vld [vmem:[%s6175_s2 + $0xe0] ss:$16 sps:$4 sm:$0xff]  }
   0xc   :  { %1422 = vmatpush1.bf16.msra.mxu1 %v4120_v12  ;;  %1261 = vmatprep.subr.bf16.mxu0 %v4124_v15  ;;  %v4154_v35 = vld [vmem:[%s6175_s2 + $0x104] ss:$16 sps:$4 sm:$0xff]   ;;  %v4158_v36 = vld [vmem:[%s6175_s2 + $0xec] ss:$16 sps:$4 sm:$0xff]   ;;  %v4156_v37 = vld [vmem:[%s6175_s2 + $0xe8] ss:$16 sps:$4 sm:$0xff]  }
   0xd   :  { %1423 = vmatprep.subr.bf16.mxu1 %v4128_v16  ;;  %v4159_v38 = vld [vmem:[%s6175_s2 + $0x100] ss:$16 sps:$4 sm:$0xff]   ;;  %v4160_v39 = vld [vmem:[%s6175_s2 + $0x124] ss:$16 sps:$4 sm:$0xff]   ;;  %v4164_v40 = vld [vmem:[%s6175_s2 + $0x10c] ss:$16 sps:$4 sm:$0xff]  }
   0xe   :  { %v4162_v41 = vld [vmem:[%s6175_s2 + $0x108] ss:$16 sps:$4 sm:$0xff]   ;;  %v4165_v42 = vld [vmem:[%s6175_s2 + $0x120] ss:$16 sps:$4 sm:$0xff]   ;;  %v4166_v43 = vld [vmem:[%s6175_s2 + $0x144] ss:$16 sps:$4 sm:$0xff]  }
   0xf   :  { %1262 = vmatpush1.bf16.msra.mxu0 %v4129_v18  ;;  %v4170_v44 = vld [vmem:[%s6175_s2 + $0x12c] ss:$16 sps:$4 sm:$0xff]   ;;  %v4168_v45 = vld [vmem:[%s6175_s2 + $0x128] ss:$16 sps:$4 sm:$0xff]   ;;  %v4171_v46 = vld [vmem:[%s6175_s2 + $0x140] ss:$16 sps:$4 sm:$0xff]  }
  0x10   :  { %1424 = vmatpush1.bf16.msra.mxu1 %v4126_v17  ;;  %1263 = vmatprep.subr.bf16.mxu0 %v4130_v19  ;;  %v4172_v47 = vld [vmem:[%s6175_s2 + $0x164] ss:$16 sps:$4 sm:$0xff]   ;;  %v4176_v48 = vld [vmem:[%s6175_s2 + $0x14c] ss:$16 sps:$4 sm:$0xff]   ;;  %v4174_v50 = vld [vmem:[%s6175_s2 + $0x148] ss:$16 sps:$4 sm:$0xff]  }
  0x11   :  { %1425 = vmatprep.subr.bf16.mxu1 %v4134_v20  ;;  %v40_v49 = vld [vmem:[%s6173_s0 + $0x8] sm:$0xff]  ;;  %v4177_v51 = vld [vmem:[%s6175_s2 + $0x160] ss:$16 sps:$4 sm:$0xff]   ;;  %v4178_v53 = vld [vmem:[%s6175_s2 + $0x184] ss:$16 sps:$4 sm:$0xff]  }
  0x12   :  { %v47_v52 = vpack.c.bf16 %v40_v49, %v40_v49  ;;  %v4182_v54 = vld [vmem:[%s6175_s2 + $0x16c] ss:$16 sps:$4 sm:$0xff]   ;;  %v4180_v55 = vld [vmem:[%s6175_s2 + $0x168] ss:$16 sps:$4 sm:$0xff]   ;;  %v4183_v56 = vld [vmem:[%s6175_s2 + $0x180] ss:$16 sps:$4 sm:$0xff]  }
  0x13   :  { %1264 = vmatpush1.bf16.msra.mxu0 %v4135_v22  ;;  %v4184_v57 = vld [vmem:[%s6175_s2 + $0x1a4] ss:$16 sps:$4 sm:$0xff]   ;;  %v4188_v58 = vld [vmem:[%s6175_s2 + $0x18c] ss:$16 sps:$4 sm:$0xff]   ;;  %v4186_v59 = vld [vmem:[%s6175_s2 + $0x188] ss:$16 sps:$4 sm:$0xff]  }
  0x14   :  { %1426 = vmatpush1.bf16.msra.mxu1 %v4132_v21  ;;  %1265 = vmatprep.subr.bf16.mxu0 %v4136_v23  ;;  %v4189_v60 = vld [vmem:[%s6175_s2 + $0x1a0] ss:$16 sps:$4 sm:$0xff]   ;;  %v4190_v61 = vld [vmem:[%s6175_s2 + $0x1c4] ss:$16 sps:$4 sm:$0xff]   ;;  %v4194_v62 = vld [vmem:[%s6175_s2 + $0x1ac] ss:$16 sps:$4 sm:$0xff]  }
  0x15   :  { %1427 = vmatprep.subr.bf16.mxu1 %v4140_v24  ;;  %1287 = vmatprep.mubr.bf16.mxu0 %v47_v52  ;;  %v4192_v63 = vld [vmem:[%s6175_s2 + $0x1a8] ss:$16 sps:$4 sm:$0xff]   ;;  %v4195_v0 = vld [vmem:[%s6175_s2 + $0x1c0] ss:$16 sps:$4 sm:$0xff]   ;;  %v4196_v1 = vld [vmem:[%s6175_s2 + $0x1e4] ss:$16 sps:$4 sm:$0xff]  }
  0x16   :  { %1451 = vmatprep.mubr.bf16.mxu1 %v47_v52  ;;  %v4200_v3 = vld [vmem:[%s6175_s2 + $0x1cc] ss:$16 sps:$4 sm:$0xff]   ;;  %v4198_v4 = vld [vmem:[%s6175_s2 + $0x1c8] ss:$16 sps:$4 sm:$0xff]   ;;  %v4201_v5 = vld [vmem:[%s6175_s2 + $0x1e0] ss:$16 sps:$4 sm:$0xff]  }
  0x17   :  { %1266 = vmatpush1.bf16.msra.mxu0 %v4141_v26  ;;  %v4204_v6 = vld [vmem:[%s6175_s2 + $0x204] ss:$16 sps:$4 sm:$0xff]   ;;  %v4207_v9 = vld [vmem:[%s6175_s2 + $0x1ec] ss:$16 sps:$4 sm:$0xff]   ;;  %v4202_v10 = vld [vmem:[%s6175_s2 + $0x200] ss:$16 sps:$4 sm:$0xff]  }
  0x18   :  { %1428 = vmatpush1.bf16.msra.mxu1 %v4138_v25  ;;  %1267 = vmatprep.subr.bf16.mxu0 %v4142_v27  ;;  %v39_v8 = vld [vmem:[%s6173_s0] sm:$0xff]  ;;  %v4205_v12 = vld [vmem:[%s6175_s2 + $0x1e8] ss:$16 sps:$4 sm:$0xff]   ;;  %v4213_v14 = vld [vmem:[%s6175_s2 + $0x20c] ss:$16 sps:$4 sm:$0xff]  }
  0x19   :  { %1429 = vmatprep.subr.bf16.mxu1 %v4146_v28  ;;  %v46_v11 = vpack.c.bf16 %v39_v8, %v39_v8  ;;  %v4210_v13 = vld [vmem:[%s6175_s2 + $0x224] ss:$16 sps:$4 sm:$0xff]   ;;  %v4208_v15 = vld [vmem:[%s6175_s2 + $0x220] ss:$16 sps:$4 sm:$0xff]   ;;  %v4211_v16 = vld [vmem:[%s6175_s2 + $0x208] ss:$16 sps:$4 sm:$0xff]  }
  0x1a   :  { %v4216_v17 = vld [vmem:[%s6175_s2 + $0x244] ss:$16 sps:$4 sm:$0xff]   ;;  %v4219_v18 = vld [vmem:[%s6175_s2 + $0x22c] ss:$16 sps:$4 sm:$0xff]   ;;  %v4214_v19 = vld [vmem:[%s6175_s2 + $0x240] ss:$16 sps:$4 sm:$0xff]  }
  0x1b   :  { %1268 = vmatpush1.bf16.msra.mxu0 %v4147_v30  ;;  %v4217_v20 = vld [vmem:[%s6175_s2 + $0x228] ss:$16 sps:$4 sm:$0xff]   ;;  %v4222_v21 = vld [vmem:[%s6175_s2 + $0x264] ss:$16 sps:$4 sm:$0xff]   ;;  %v4225_v22 = vld [vmem:[%s6175_s2 + $0x24c] ss:$16 sps:$4 sm:$0xff]  }
  0x1c   :  { %1430 = vmatpush1.bf16.msra.mxu1 %v4144_v29  ;;  %1269 = vmatprep.subr.bf16.mxu0 %v4148_v31  ;;  %v4220_v23 = vld [vmem:[%s6175_s2 + $0x260] ss:$16 sps:$4 sm:$0xff]   ;;  %v4223_v24 = vld [vmem:[%s6175_s2 + $0x248] ss:$16 sps:$4 sm:$0xff]   ;;  %v4228_v25 = vld [vmem:[%s6175_s2 + $0x284] ss:$16 sps:$4 sm:$0xff]  }
  0x1d   :  { %1431 = vmatprep.subr.bf16.mxu1 %v4152_v32  ;;  %v4231_v26 = vld [vmem:[%s6175_s2 + $0x26c] ss:$16 sps:$4 sm:$0xff]   ;;  %v4226_v27 = vld [vmem:[%s6175_s2 + $0x280] ss:$16 sps:$4 sm:$0xff]   ;;  %v4229_v28 = vld [vmem:[%s6175_s2 + $0x268] ss:$16 sps:$4 sm:$0xff]  }
  0x1e   :  { %v4234_v29 = vld [vmem:[%s6175_s2 + $0x2a4] ss:$16 sps:$4 sm:$0xff]   ;;  %v4237_v30 = vld [vmem:[%s6175_s2 + $0x28c] ss:$16 sps:$4 sm:$0xff]   ;;  %v4232_v31 = vld [vmem:[%s6175_s2 + $0x2a0] ss:$16 sps:$4 sm:$0xff]  }
  0x1f   :  { %1270 = vmatpush1.bf16.msra.mxu0 %v4153_v34  ;;  %v4235_v32 = vld [vmem:[%s6175_s2 + $0x288] ss:$16 sps:$4 sm:$0xff]   ;;  %v4243_v34 = vld [vmem:[%s6175_s2 + $0x2ac] ss:$16 sps:$4 sm:$0xff]   ;;  %v4256_v49 = vld [vmem:[%s6175_s2 + $0x320] ss:$16 sps:$4 sm:$0xff]  }
  0x20   :  { %1432 = vmatpush1.bf16.msra.mxu1 %v4150_v33  ;;  %1271 = vmatprep.subr.bf16.mxu0 %v4154_v35  ;;  %v4240_v33 = vld [vmem:[%s6175_s2 + $0x2c4] ss:$16 sps:$4 sm:$0xff]   ;;  %v42_v35 = vld [vmem:[%s6173_s0 + $0x18] sm:$0xff] }
  0x21   :  { %1433 = vmatprep.subr.bf16.mxu1 %v4158_v36  ;;  %v4238_v36 = vld [vmem:[%s6175_s2 + $0x2c0] ss:$16 sps:$4 sm:$0xff]   ;;  %v4267_v52 = vld [vmem:[%s6175_s2 + $0x32c] ss:$16 sps:$4 sm:$0xff]   ;;  %v4289_v8 = vld [vmem:[%s6175_s2 + $0x3a8] ss:$16 sps:$4 sm:$0xff]  }
  0x23   :  { %1272 = vmatpush1.bf16.msra.mxu0 %v4159_v38  ;;  %v4241_v38 = vld [vmem:[%s6175_s2 + $0x2a8] ss:$16 sps:$4 sm:$0xff]  }
  0x24   :  { %1434 = vmatpush1.bf16.msra.mxu1 %v4156_v37  ;;  %1273 = vmatprep.subr.bf16.mxu0 %v4160_v39  ;;  %v49_v37 = vpack.c.bf16 %v42_v35, %v42_v35  ;;  %v4246_v39 = vld [vmem:[%s6175_s2 + $0x2e4] ss:$16 sps:$4 sm:$0xff]   ;;  %v4322_v35 = vld [vmem:[%s6175_s2 + $0x480] ss:$16 sps:$4 sm:$0xff]  }
  0x25   :  { %1435 = vmatprep.subr.bf16.mxu1 %v4164_v40  ;;  %v4249_v40 = vld [vmem:[%s6175_s2 + $0x2cc] ss:$16 sps:$4 sm:$0xff]  }
  0x27   :  { %1274 = vmatpush1.bf16.msra.mxu0 %v4165_v42  ;;  %v4247_v42 = vld [vmem:[%s6175_s2 + $0x2c8] ss:$16 sps:$4 sm:$0xff]  }
  0x28   :  { %1436 = vmatpush1.bf16.msra.mxu1 %v4162_v41  ;;  %1275 = vmatprep.subr.bf16.mxu0 %v4166_v43  ;;  %v4244_v41 = vld [vmem:[%s6175_s2 + $0x2e0] ss:$16 sps:$4 sm:$0xff]   ;;  %v4252_v43 = vld [vmem:[%s6175_s2 + $0x304] ss:$16 sps:$4 sm:$0xff]  }
  0x29   :  { %1437 = vmatprep.subr.bf16.mxu1 %v4170_v44  ;;  %v4255_v44 = vld [vmem:[%s6175_s2 + $0x2ec] ss:$16 sps:$4 sm:$0xff]  }
  0x2b   :  { %1276 = vmatpush1.bf16.msra.mxu0 %v4171_v46  ;;  %v4253_v46 = vld [vmem:[%s6175_s2 + $0x2e8] ss:$16 sps:$4 sm:$0xff]  }
  0x2c   :  { %1438 = vmatpush1.bf16.msra.mxu1 %v4168_v45  ;;  %1277 = vmatprep.subr.bf16.mxu0 %v4172_v47  ;;  %v4250_v45 = vld [vmem:[%s6175_s2 + $0x300] ss:$16 sps:$4 sm:$0xff]   ;;  %v4258_v47 = vld [vmem:[%s6175_s2 + $0x324] ss:$16 sps:$4 sm:$0xff]  }
  0x2d   :  { %1439 = vmatprep.subr.bf16.mxu1 %v4176_v48  ;;  %v4261_v48 = vld [vmem:[%s6175_s2 + $0x30c] ss:$16 sps:$4 sm:$0xff]  }
  0x2f   :  { %1278 = vmatpush1.bf16.msra.mxu0 %v4177_v51  ;;  %v4264_v51 = vld [vmem:[%s6175_s2 + $0x344] ss:$16 sps:$4 sm:$0xff]  }
  0x30   :  { %1440 = vmatpush1.bf16.msra.mxu1 %v4174_v50  ;;  %1279 = vmatprep.subr.bf16.mxu0 %v4178_v53  ;;  %v4259_v50 = vld [vmem:[%s6175_s2 + $0x308] ss:$16 sps:$4 sm:$0xff]   ;;  %v4262_v53 = vld [vmem:[%s6175_s2 + $0x340] ss:$16 sps:$4 sm:$0xff]  }
  0x31   :  { %1441 = vmatprep.subr.bf16.mxu1 %v4182_v54  ;;  %v4265_v54 = vld [vmem:[%s6175_s2 + $0x328] ss:$16 sps:$4 sm:$0xff]  }
  0x33   :  { %1280 = vmatpush1.bf16.msra.mxu0 %v4183_v56  ;;  %v4273_v56 = vld [vmem:[%s6175_s2 + $0x34c] ss:$16 sps:$4 sm:$0xff]  }
  0x34   :  { %1442 = vmatpush1.bf16.msra.mxu1 %v4180_v55  ;;  %1281 = vmatprep.subr.bf16.mxu0 %v4184_v57  ;;  %v4270_v55 = vld [vmem:[%s6175_s2 + $0x364] ss:$16 sps:$4 sm:$0xff]   ;;  %v4268_v57 = vld [vmem:[%s6175_s2 + $0x360] ss:$16 sps:$4 sm:$0xff]  }
  0x35   :  { %1443 = vmatprep.subr.bf16.mxu1 %v4188_v58  ;;  %v4271_v58 = vld [vmem:[%s6175_s2 + $0x348] ss:$16 sps:$4 sm:$0xff]  }
  0x37   :  { %1282 = vmatpush1.bf16.msra.mxu0 %v4189_v60  ;;  %v4279_v60 = vld [vmem:[%s6175_s2 + $0x36c] ss:$16 sps:$4 sm:$0xff]  }
  0x38   :  { %1444 = vmatpush1.bf16.msra.mxu1 %v4186_v59  ;;  %1283 = vmatprep.subr.bf16.mxu0 %v4190_v61  ;;  %v4276_v59 = vld [vmem:[%s6175_s2 + $0x384] ss:$16 sps:$4 sm:$0xff]   ;;  %v4274_v61 = vld [vmem:[%s6175_s2 + $0x380] ss:$16 sps:$4 sm:$0xff]  }
  0x39   :  { %1445 = vmatprep.subr.bf16.mxu1 %v4194_v62  ;;  %v4277_v62 = vld [vmem:[%s6175_s2 + $0x368] ss:$16 sps:$4 sm:$0xff]  }
  0x3b   :  { %1284 = vmatpush1.bf16.msra.mxu0 %v4195_v0  ;;  %v4285_v0 = vld [vmem:[%s6175_s2 + $0x38c] ss:$16 sps:$4 sm:$0xff]  }
  0x3c   :  { %1446 = vmatpush1.bf16.msra.mxu1 %v4192_v63  ;;  %1285 = vmatprep.subr.bf16.mxu0 %v4196_v1  ;;  %v4282_v63 = vld [vmem:[%s6175_s2 + $0x3a4] ss:$16 sps:$4 sm:$0xff]   ;;  %v4280_v1 = vld [vmem:[%s6175_s2 + $0x3a0] ss:$16 sps:$4 sm:$0xff]  }
  0x3d   :  { %1447 = vmatprep.subr.bf16.mxu1 %v4200_v3  ;;  %v4283_v3 = vld [vmem:[%s6175_s2 + $0x388] ss:$16 sps:$4 sm:$0xff]  }
  0x3f   :  { %1286 = vmatpush1.bf16.msra.mxu0 %v4201_v5  ;;  %v4291_v5 = vld [vmem:[%s6175_s2 + $0x3ac] ss:$16 sps:$4 sm:$0xff]  }
  0x40   :  { %1448 = vmatpush1.bf16.msra.mxu1 %v4198_v4  ;;  %1296 = vmatprep.subr.bf16.mxu0 %v4204_v6  ;;  %v4288_v4 = vld [vmem:[%s6175_s2 + $0x3c4] ss:$16 sps:$4 sm:$0xff]   ;;  %v4286_v6 = vld [vmem:[%s6175_s2 + $0x3c0] ss:$16 sps:$4 sm:$0xff]  }
  0x41   :  { %1449 = vmatprep.subr.bf16.mxu1 %v4207_v9  ;;  %v4294_v9 = vld [vmem:[%s6175_s2 + $0x3e4] ss:$16 sps:$4 sm:$0xff]  }
  0x42   :  { %1288 = vmatmul.mubr.bf16.vlgmr.msra.gmra.mrb[0].mxu0 %v46_v11 }
  0x43   :  { %1297 = vmatpush1.bf16.msra.mxu0 %v4202_v10  ;;  %1328 = vmatprep.mubr.bf16.mxu0 %v49_v37  ;;  %v4297_v10 = vld [vmem:[%s6175_s2 + $0x3cc] ss:$16 sps:$4 sm:$0xff]  }
  0x44   :  { %1450 = vmatpush1.bf16.msra.mxu1 %v4205_v12  ;;  %1298 = vmatprep.subr.bf16.mxu0 %v4210_v13  ;;  %v4295_v12 = vld [vmem:[%s6175_s2 + $0x3c8] ss:$16 sps:$4 sm:$0xff]   ;;  %v41_v13 = vld [vmem:[%s6173_s0 + $0x10] sm:$0xff] }
  0x45   :  { %1460 = vmatprep.subr.bf16.mxu1 %v4213_v14  ;;  %v4300_v14 = vld [vmem:[%s6175_s2 + $0x404] ss:$16 sps:$4 sm:$0xff]  }
  0x47   :  { %1452 = vmatmul.mubr.bf16.vlgmr.msra.gmra.mrb[4].mxu1 %v46_v11  ;;  %1299 = vmatpush1.bf16.msra.mxu0 %v4208_v15  ;;  %v4292_v11 = vld [vmem:[%s6175_s2 + $0x3e0] ss:$16 sps:$4 sm:$0xff]   ;;  %v4303_v15 = vld [vmem:[%s6175_s2 + $0x3ec] ss:$16 sps:$4 sm:$0xff]  }
  0x48   :  { %1461 = vmatpush1.bf16.msra.mxu1 %v4211_v16  ;;  %1300 = vmatprep.subr.bf16.mxu0 %v4216_v17  ;;  %v4298_v16 = vld [vmem:[%s6175_s2 + $0x400] ss:$16 sps:$4 sm:$0xff]   ;;  %v48_v17 = vpack.c.bf16 %v41_v13, %v41_v13 }
  0x49   :  { %1462 = vmatprep.subr.bf16.mxu1 %v4219_v18  ;;  %1492 = vmatprep.mubr.bf16.mxu1 %v49_v37  ;;  %v4301_v18 = vld [vmem:[%s6175_s2 + $0x3e8] ss:$16 sps:$4 sm:$0xff]   ;;  %v4330_v37 = vld [vmem:[%s6175_s2 + $0x4a4] ss:$16 sps:$4 sm:$0xff]   ;;  %v4382_v13 = vld [vmem:[%s6175_s2 + $0x5c0] ss:$16 sps:$4 sm:$0xff]  }
  0x4b   :  { %1301 = vmatpush1.bf16.msra.mxu0 %v4214_v19  ;;  %v4306_v19 = vld [vmem:[%s6175_s2 + $0x424] ss:$16 sps:$4 sm:$0xff]  }
  0x4c   :  { %1463 = vmatpush1.bf16.msra.mxu1 %v4217_v20  ;;  %1302 = vmatprep.subr.bf16.mxu0 %v4222_v21  ;;  %v4309_v20 = vld [vmem:[%s6175_s2 + $0x40c] ss:$16 sps:$4 sm:$0xff]  }
  0x4d   :  { %1464 = vmatprep.subr.bf16.mxu1 %v4225_v22  ;;  %v44_v21 = vld [vmem:[%s6173_s0 + $0x28] sm:$0xff] }
  0x4e   :  { %v51_v22 = vpack.c.bf16 %v44_v21, %v44_v21  ;;  %v4400_v21 = vld [vmem:[%s6177_s4 + $0x40] sm:$0xff]  }
  0x4f   :  { %1303 = vmatpush1.bf16.msra.mxu0 %v4220_v23  ;;  %v4304_v23 = vld [vmem:[%s6175_s2 + $0x420] ss:$16 sps:$4 sm:$0xff]  }
  0x50   :  { %1465 = vmatpush1.bf16.msra.mxu1 %v4223_v24  ;;  %1304 = vmatprep.subr.bf16.mxu0 %v4228_v25  ;;  %v4307_v24 = vld [vmem:[%s6175_s2 + $0x408] ss:$16 sps:$4 sm:$0xff]   ;;  %v4312_v25 = vld [vmem:[%s6175_s2 + $0x444] ss:$16 sps:$4 sm:$0xff]  }
  0x51   :  { %1466 = vmatprep.subr.bf16.mxu1 %v4231_v26  ;;  %v4315_v26 = vld [vmem:[%s6175_s2 + $0x42c] ss:$16 sps:$4 sm:$0xff]  }
  0x53   :  { %1305 = vmatpush1.bf16.msra.mxu0 %v4226_v27  ;;  %v4310_v27 = vld [vmem:[%s6175_s2 + $0x440] ss:$16 sps:$4 sm:$0xff]  }
  0x54   :  { %1467 = vmatpush1.bf16.msra.mxu1 %v4229_v28  ;;  %1306 = vmatprep.subr.bf16.mxu0 %v4234_v29  ;;  %v4313_v28 = vld [vmem:[%s6175_s2 + $0x428] ss:$16 sps:$4 sm:$0xff]   ;;  %v4318_v29 = vld [vmem:[%s6175_s2 + $0x464] ss:$16 sps:$4 sm:$0xff]  }
  0x55   :  { %1468 = vmatprep.subr.bf16.mxu1 %v4237_v30  ;;  %v4321_v30 = vld [vmem:[%s6175_s2 + $0x44c] ss:$16 sps:$4 sm:$0xff]  }
  0x57   :  { %1307 = vmatpush1.bf16.msra.mxu0 %v4232_v31  ;;  %v4316_v31 = vld [vmem:[%s6175_s2 + $0x460] ss:$16 sps:$4 sm:$0xff]  }
  0x58   :  { %1469 = vmatpush1.bf16.msra.mxu1 %v4235_v32  ;;  %1308 = vmatprep.subr.bf16.mxu0 %v4240_v33  ;;  %v4319_v32 = vld [vmem:[%s6175_s2 + $0x448] ss:$16 sps:$4 sm:$0xff]   ;;  %v4324_v33 = vld [vmem:[%s6175_s2 + $0x484] ss:$16 sps:$4 sm:$0xff]  }
  0x59   :  { %1470 = vmatprep.subr.bf16.mxu1 %v4243_v34  ;;  %v4327_v34 = vld [vmem:[%s6175_s2 + $0x46c] ss:$16 sps:$4 sm:$0xff]  }
  0x5b   :  { %1309 = vmatpush1.bf16.msra.mxu0 %v4238_v36  ;;  %v4325_v36 = vld [vmem:[%s6175_s2 + $0x468] ss:$16 sps:$4 sm:$0xff]  }
  0x5c   :  { %1471 = vmatpush1.bf16.msra.mxu1 %v4241_v38  ;;  %1310 = vmatprep.subr.bf16.mxu0 %v4246_v39  ;;  %v4333_v38 = vld [vmem:[%s6175_s2 + $0x48c] ss:$16 sps:$4 sm:$0xff]   ;;  %v4328_v39 = vld [vmem:[%s6175_s2 + $0x4a0] ss:$16 sps:$4 sm:$0xff]  }
  0x5d   :  { %1472 = vmatprep.subr.bf16.mxu1 %v4249_v40  ;;  %v4331_v40 = vld [vmem:[%s6175_s2 + $0x488] ss:$16 sps:$4 sm:$0xff]  }
  0x5f   :  { %1311 = vmatpush1.bf16.msra.mxu0 %v4244_v41  ;;  %v4336_v41 = vld [vmem:[%s6175_s2 + $0x4c4] ss:$16 sps:$4 sm:$0xff]  }
  0x60   :  { %1473 = vmatpush1.bf16.msra.mxu1 %v4247_v42  ;;  %1312 = vmatprep.subr.bf16.mxu0 %v4252_v43  ;;  %v4339_v42 = vld [vmem:[%s6175_s2 + $0x4ac] ss:$16 sps:$4 sm:$0xff]   ;;  %v4334_v43 = vld [vmem:[%s6175_s2 + $0x4c0] ss:$16 sps:$4 sm:$0xff]  }
  0x61   :  { %1474 = vmatprep.subr.bf16.mxu1 %v4255_v44  ;;  %v4337_v44 = vld [vmem:[%s6175_s2 + $0x4a8] ss:$16 sps:$4 sm:$0xff]  }
  0x63   :  { %1313 = vmatpush1.bf16.msra.mxu0 %v4250_v45  ;;  %v4342_v45 = vld [vmem:[%s6175_s2 + $0x4e4] ss:$16 sps:$4 sm:$0xff]  }
  0x64   :  { %1475 = vmatpush1.bf16.msra.mxu1 %v4253_v46  ;;  %1314 = vmatprep.subr.bf16.mxu0 %v4258_v47  ;;  %v4345_v46 = vld [vmem:[%s6175_s2 + $0x4cc] ss:$16 sps:$4 sm:$0xff]   ;;  %v4340_v47 = vld [vmem:[%s6175_s2 + $0x4e0] ss:$16 sps:$4 sm:$0xff]  }
  0x65   :  { %1476 = vmatprep.subr.bf16.mxu1 %v4261_v48  ;;  %v4343_v48 = vld [vmem:[%s6175_s2 + $0x4c8] ss:$16 sps:$4 sm:$0xff]  }
  0x67   :  { %1315 = vmatpush1.bf16.msra.mxu0 %v4256_v49  ;;  %v4348_v49 = vld [vmem:[%s6175_s2 + $0x504] ss:$16 sps:$4 sm:$0xff]  }
  0x68   :  { %1477 = vmatpush1.bf16.msra.mxu1 %v4259_v50  ;;  %1316 = vmatprep.subr.bf16.mxu0 %v4264_v51  ;;  %v4351_v50 = vld [vmem:[%s6175_s2 + $0x4ec] ss:$16 sps:$4 sm:$0xff]   ;;  %v4346_v51 = vld [vmem:[%s6175_s2 + $0x500] ss:$16 sps:$4 sm:$0xff]  }
  0x69   :  { %1478 = vmatprep.subr.bf16.mxu1 %v4267_v52  ;;  %v4349_v52 = vld [vmem:[%s6175_s2 + $0x4e8] ss:$16 sps:$4 sm:$0xff]  }
  0x6b   :  { %1317 = vmatpush1.bf16.msra.mxu0 %v4262_v53  ;;  %v4354_v53 = vld [vmem:[%s6175_s2 + $0x524] ss:$16 sps:$4 sm:$0xff]  }
  0x6c   :  { %1479 = vmatpush1.bf16.msra.mxu1 %v4265_v54  ;;  %1318 = vmatprep.subr.bf16.mxu0 %v4270_v55  ;;  %v4357_v54 = vld [vmem:[%s6175_s2 + $0x50c] ss:$16 sps:$4 sm:$0xff]   ;;  %v4352_v55 = vld [vmem:[%s6175_s2 + $0x520] ss:$16 sps:$4 sm:$0xff]  }
  0x6d   :  { %1480 = vmatprep.subr.bf16.mxu1 %v4273_v56  ;;  %v4355_v56 = vld [vmem:[%s6175_s2 + $0x508] ss:$16 sps:$4 sm:$0xff]  }
  0x6f   :  { %1319 = vmatpush1.bf16.msra.mxu0 %v4268_v57  ;;  %v4360_v57 = vld [vmem:[%s6175_s2 + $0x544] ss:$16 sps:$4 sm:$0xff]  }
  0x70   :  { %1481 = vmatpush1.bf16.msra.mxu1 %v4271_v58  ;;  %1320 = vmatprep.subr.bf16.mxu0 %v4276_v59  ;;  %v4363_v58 = vld [vmem:[%s6175_s2 + $0x52c] ss:$16 sps:$4 sm:$0xff]   ;;  %v4358_v59 = vld [vmem:[%s6175_s2 + $0x540] ss:$16 sps:$4 sm:$0xff]  }
  0x71   :  { %1482 = vmatprep.subr.bf16.mxu1 %v4279_v60  ;;  %v4361_v60 = vld [vmem:[%s6175_s2 + $0x528] ss:$16 sps:$4 sm:$0xff]  }
  0x73   :  { %1321 = vmatpush1.bf16.msra.mxu0 %v4274_v61  ;;  %v4366_v61 = vld [vmem:[%s6175_s2 + $0x564] ss:$16 sps:$4 sm:$0xff]  }
  0x74   :  { %1483 = vmatpush1.bf16.msra.mxu1 %v4277_v62  ;;  %1322 = vmatprep.subr.bf16.mxu0 %v4282_v63  ;;  %v4369_v62 = vld [vmem:[%s6175_s2 + $0x54c] ss:$16 sps:$4 sm:$0xff]   ;;  %v4364_v63 = vld [vmem:[%s6175_s2 + $0x560] ss:$16 sps:$4 sm:$0xff]  }
  0x75   :  { %1484 = vmatprep.subr.bf16.mxu1 %v4285_v0  ;;  %v4367_v0 = vld [vmem:[%s6175_s2 + $0x548] ss:$16 sps:$4 sm:$0xff]  }
  0x77   :  { %1323 = vmatpush1.bf16.msra.mxu0 %v4280_v1  ;;  %v4372_v1 = vld [vmem:[%s6175_s2 + $0x584] ss:$16 sps:$4 sm:$0xff]  }
  0x78   :  { %1485 = vmatpush1.bf16.msra.mxu1 %v4283_v3  ;;  %1324 = vmatprep.subr.bf16.mxu0 %v4288_v4  ;;  %v4375_v3 = vld [vmem:[%s6175_s2 + $0x56c] ss:$16 sps:$4 sm:$0xff]   ;;  %v4370_v4 = vld [vmem:[%s6175_s2 + $0x580] ss:$16 sps:$4 sm:$0xff]  }
  0x79   :  { %1486 = vmatprep.subr.bf16.mxu1 %v4291_v5  ;;  %v4373_v5 = vld [vmem:[%s6175_s2 + $0x568] ss:$16 sps:$4 sm:$0xff]  }
  0x7b   :  { %1325 = vmatpush1.bf16.msra.mxu0 %v4286_v6  ;;  %v4378_v6 = vld [vmem:[%s6175_s2 + $0x5a4] ss:$16 sps:$4 sm:$0xff]  }
  0x7c   :  { %1487 = vmatpush1.bf16.msra.mxu1 %v4289_v8  ;;  %1326 = vmatprep.subr.bf16.mxu0 %v4294_v9  ;;  %v4381_v8 = vld [vmem:[%s6175_s2 + $0x58c] ss:$16 sps:$4 sm:$0xff]   ;;  %v4376_v9 = vld [vmem:[%s6175_s2 + $0x5a0] ss:$16 sps:$4 sm:$0xff]  }
  0x7d   :  { %1488 = vmatprep.subr.bf16.mxu1 %v4297_v10  ;;  %v4379_v10 = vld [vmem:[%s6175_s2 + $0x588] ss:$16 sps:$4 sm:$0xff]  }
  0x7f   :  { %1327 = vmatpush1.bf16.msra.mxu0 %v4292_v11  ;;  %v4384_v11 = vld [vmem:[%s6175_s2 + $0x5c4] ss:$16 sps:$4 sm:$0xff]  }
  0x80   :  { %1489 = vmatpush1.bf16.msra.mxu1 %v4295_v12  ;;  %1337 = vmatprep.subr.bf16.mxu0 %v4300_v14  ;;  %v4387_v12 = vld [vmem:[%s6175_s2 + $0x5ac] ss:$16 sps:$4 sm:$0xff]   ;;  %v4385_v14 = vld [vmem:[%s6175_s2 + $0x5a8] ss:$16 sps:$4 sm:$0xff]  }
  0x81   :  { %1490 = vmatprep.subr.bf16.mxu1 %v4303_v15  ;;  %v4390_v15 = vld [vmem:[%s6175_s2 + $0x5e4] ss:$16 sps:$4 sm:$0xff]  }
  0x82   :  { %1329 = vmatmul.mubr.bf16.vlgmr.msra.gmra.mrb[0].mxu0 %v48_v17 }
  0x83   :  { %1338 = vmatpush1.bf16.msra.mxu0 %v4298_v16  ;;  %1369 = vmatprep.mubr.bf16.mxu0 %v51_v22  ;;  %v4393_v16 = vld [vmem:[%s6175_s2 + $0x5cc] ss:$16 sps:$4 sm:$0xff]  }
  0x84   :  { %1491 = vmatpush1.bf16.msra.mxu1 %v4301_v18  ;;  %1339 = vmatprep.subr.bf16.mxu0 %v4306_v19  ;;  %v4391_v18 = vld [vmem:[%s6175_s2 + $0x5c8] ss:$16 sps:$4 sm:$0xff]   ;;  %v43_v19 = vld [vmem:[%s6173_s0 + $0x20] sm:$0xff] }
  0x85   :  { %1501 = vmatprep.subr.bf16.mxu1 %v4309_v20  ;;  %v4396_v20 = vld [vmem:[%s6175_s2 + $0x5ec] ss:$16 sps:$4 sm:$0xff]  }
  0x87   :  { %1493 = vmatmul.mubr.bf16.vlgmr.msra.gmra.mrb[4].mxu1 %v48_v17  ;;  %1340 = vmatpush1.bf16.msra.mxu0 %v4304_v23  ;;  %v4388_v17 = vld [vmem:[%s6175_s2 + $0x5e0] ss:$16 sps:$4 sm:$0xff]  }
  0x88   :  { %1502 = vmatpush1.bf16.msra.mxu1 %v4307_v24  ;;  %1341 = vmatprep.subr.bf16.mxu0 %v4312_v25  ;;  %v4401_v23 = vld [vmem:[%s6177_s4] sm:$0xff]   ;;  %v50_v24 = vpack.c.bf16 %v43_v19, %v43_v19  ;;  %v4399_v25 = vld [vmem:[%s6175_s2 + $0x60c] ss:$16 sps:$4 sm:$0xff]  }
  0x89   :  { %1503 = vmatprep.subr.bf16.mxu1 %v4315_v26  ;;  %1533 = vmatprep.mubr.bf16.mxu1 %v51_v22  ;;  %v4394_v22 = vld [vmem:[%s6175_s2 + $0x5e8] ss:$16 sps:$4 sm:$0xff]  }
  0x8a   :  { %v4402_v26 = vld [vmem:[%s6177_s4 + $0x48] sm:$0xff]  }
  0x8b   :  { %1342 = vmatpush1.bf16.msra.mxu0 %v4310_v27  ;;  %v4397_v27 = vld [vmem:[%s6175_s2 + $0x608] ss:$16 sps:$4 sm:$0xff]  }
  0x8c   :  { %1504 = vmatpush1.bf16.msra.mxu1 %v4313_v28  ;;  %1343 = vmatprep.subr.bf16.mxu0 %v4318_v29  ;;  %v4403_v28 = vld [vmem:[%s6177_s4 + $0x8] sm:$0xff]   ;;  %v4404_v29 = vld [vmem:[%s6177_s4 + $0x50] sm:$0xff]  }
  0x8d   :  { %1505 = vmatprep.subr.bf16.mxu1 %v4321_v30  ;;  %v4405_v30 = vld [vmem:[%s6177_s4 + $0x10] sm:$0xff]  }
  0x8f   :  { %1344 = vmatpush1.bf16.msra.mxu0 %v4316_v31  ;;  %v4407_v31 = vld [vmem:[%s6177_s4 + $0x58] sm:$0xff]  }
  0x90   :  { %1506 = vmatpush1.bf16.msra.mxu1 %v4319_v32  ;;  %1345 = vmatprep.subr.bf16.mxu0 %v4324_v33  ;;  %v4408_v32 = vld [vmem:[%s6177_s4 + $0x18] sm:$0xff]   ;;  %v4410_v33 = vld [vmem:[%s6177_s4 + $0x60] sm:$0xff]  }
  0x91   :  { %1507 = vmatprep.subr.bf16.mxu1 %v4327_v34  ;;  %v4406_v34 = vld [vmem:[%s6177_s4 + $0x80] sm:$0xff]  }
  0x93   :  { %1346 = vmatpush1.bf16.msra.mxu0 %v4322_v35  ;;  %v4411_v35 = vld [vmem:[%s6177_s4 + $0x20] sm:$0xff]  }
  0x94   :  { %1508 = vmatpush1.bf16.msra.mxu1 %v4325_v36  ;;  %1347 = vmatprep.subr.bf16.mxu0 %v4330_v37  ;;  %v4413_v36 = vld [vmem:[%s6177_s4 + $0x68] sm:$0xff]  }
  0x95   :  { %1509 = vmatprep.subr.bf16.mxu1 %v4333_v38  ;;  %v4409_v37 = vld [vmem:[%s6177_s4 + $0x88] sm:$0xff]   ;;  %v4412_v38 = vld [vmem:[%s6177_s4 + $0x90] sm:$0xff]  }
  0x97   :  { %1348 = vmatpush1.bf16.msra.mxu0 %v4328_v39 }
  0x98   :  { %1510 = vmatpush1.bf16.msra.mxu1 %v4331_v40  ;;  %1349 = vmatprep.subr.bf16.mxu0 %v4336_v41 }
  0x99   :  { %1511 = vmatprep.subr.bf16.mxu1 %v4339_v42 }
  0x9b   :  { %1350 = vmatpush1.bf16.msra.mxu0 %v4334_v43 }
  0x9c   :  { %1512 = vmatpush1.bf16.msra.mxu1 %v4337_v44  ;;  %1351 = vmatprep.subr.bf16.mxu0 %v4342_v45 }
  0x9d   :  { %1513 = vmatprep.subr.bf16.mxu1 %v4345_v46 }
  0x9f   :  { %1352 = vmatpush1.bf16.msra.mxu0 %v4340_v47 }
  0xa0   :  { %1514 = vmatpush1.bf16.msra.mxu1 %v4343_v48  ;;  %1353 = vmatprep.subr.bf16.mxu0 %v4348_v49 }
  0xa1   :  { %1515 = vmatprep.subr.bf16.mxu1 %v4351_v50 }
  0xa3   :  { %1354 = vmatpush1.bf16.msra.mxu0 %v4346_v51 }
  0xa4   :  { %1516 = vmatpush1.bf16.msra.mxu1 %v4349_v52  ;;  %1355 = vmatprep.subr.bf16.mxu0 %v4354_v53 }
  0xa5   :  { %1517 = vmatprep.subr.bf16.mxu1 %v4357_v54 }
  0xa7   :  { %1356 = vmatpush1.bf16.msra.mxu0 %v4352_v55 }
  0xa8   :  { %1518 = vmatpush1.bf16.msra.mxu1 %v4355_v56  ;;  %1357 = vmatprep.subr.bf16.mxu0 %v4360_v57 }
  0xa9   :  { %1519 = vmatprep.subr.bf16.mxu1 %v4363_v58 }
  0xab   :  { %1358 = vmatpush1.bf16.msra.mxu0 %v4358_v59 }
  0xac   :  { %1520 = vmatpush1.bf16.msra.mxu1 %v4361_v60  ;;  %1359 = vmatprep.subr.bf16.mxu0 %v4366_v61 }
  0xad   :  { %1521 = vmatprep.subr.bf16.mxu1 %v4369_v62 }
  0xaf   :  { %1360 = vmatpush1.bf16.msra.mxu0 %v4364_v63 }
  0xb0   :  { %1522 = vmatpush1.bf16.msra.mxu1 %v4367_v0  ;;  %1361 = vmatprep.subr.bf16.mxu0 %v4372_v1 }
  0xb1   :  { %1523 = vmatprep.subr.bf16.mxu1 %v4375_v3 }
  0xb3   :  { %1362 = vmatpush1.bf16.msra.mxu0 %v4370_v4 }
  0xb4   :  { %1524 = vmatpush1.bf16.msra.mxu1 %v4373_v5  ;;  %1363 = vmatprep.subr.bf16.mxu0 %v4378_v6 }
  0xb5   :  { %1525 = vmatprep.subr.bf16.mxu1 %v4381_v8 }
  0xb7   :  { %1364 = vmatpush1.bf16.msra.mxu0 %v4376_v9 }
  0xb8   :  { %1526 = vmatpush1.bf16.msra.mxu1 %v4379_v10  ;;  %1365 = vmatprep.subr.bf16.mxu0 %v4384_v11 }
  0xb9   :  { %1527 = vmatprep.subr.bf16.mxu1 %v4387_v12 }
  0xbb   :  { %1366 = vmatpush1.bf16.msra.mxu0 %v4382_v13 }
  0xbc   :  { %1528 = vmatpush1.bf16.msra.mxu1 %v4385_v14  ;;  %1367 = vmatprep.subr.bf16.mxu0 %v4390_v15 }
  0xbd   :  { %1529 = vmatprep.subr.bf16.mxu1 %v4393_v16 }
  0xbf   :  { %1368 = vmatpush1.bf16.msra.mxu0 %v4388_v17 }
  0xc0   :  { %1530 = vmatpush1.bf16.msra.mxu1 %v4391_v18  ;;  %4015 = vmatprep.subr.bf16.mxu0 %v4400_v21 }
  0xc1   :  { %1531 = vmatprep.subr.bf16.mxu1 %v4396_v20 }
  0xc2   :  { %1370 = vmatmul.mubr.bf16.vlgmr.msra.gmra.mrb[0].mxu0 %v50_v24 }
  0xc3   :  { %4016 = vmatpush3.bf16.msra.mxu0 %v4401_v23 }
  0xc4   :  { %1532 = vmatpush1.bf16.msra.mxu1 %v4394_v22  ;;  %4017 = vmatprep.subr.bf16.mxu0 %v4402_v26 }
  0xc5   :  { %1542 = vmatprep.subr.bf16.mxu1 %v4399_v25 }
  0xc7   :  { %1534 = vmatmul.mubr.bf16.vlgmr.msra.gmra.mrb[4].mxu1 %v50_v24  ;;  %4018 = vmatpush3.bf16.msra.mxu0 %v4403_v28 }
  0xc8   :  { %1543 = vmatpush1.bf16.msra.mxu1 %v4397_v27  ;;  %1574 = vmatprep.mubr.bf16.mxu1 %v4739_v2 }
  0xc9   :  { %1841 = vmatprep.subr.bf16.mxu1 %v4739_v2  ;;  %4019 = vmatprep.subr.bf16.mxu0 %v4404_v29 }
  0xcb   :  { %4020 = vmatpush3.bf16.msra.mxu0 %v4405_v30 }
  0xcc   :  { %4021 = vmatprep.subr.bf16.mxu0 %v4407_v31 }
  0xcf   :  { %4022 = vmatpush3.bf16.msra.mxu0 %v4408_v32 }
  0xd0   :  { %4023 = vmatprep.subr.bf16.mxu0 %v4410_v33 }
  0xd3   :  { %3789 = vmatmul.mubr.msk.bf16.vlgmr.msra.gmra.mrb[4].mxu1 %vm1251_vm0, %v4821_v7  ;;  %4024 = vmatpush3.bf16.msra.mxu0 %v4411_v35 }
  0xd4   :  { %1842 = vmatpush1.bf16.msra.mxu1 %v4406_v34  ;;  %4025 = vmatprep.subr.bf16.mxu0 %v4413_v36 }
  0xd5   :  { %1843 = vmatprep.subr.bf16.mxu1 %v4739_v2 }
  0xd8   :  { %1844 = vmatpush1.bf16.msra.mxu1 %v4409_v37 }
  0xd9   :  { %1845 = vmatprep.subr.bf16.mxu1 %v4739_v2 }
  0xda   :  { %v1412_v39 = vpop.f32.mrb[0].mxu1 }
  0xdb   :  { %v1414_v40 = vpop.f32.mrb[1].mxu1 }
  0xdc   :  { %v1416_v41 = vpop.f32.mrb[2].mxu1  ;;  %1846 = vmatpush1.bf16.msra.mxu1 %v4412_v38 }
  0xdd   :  { %v1417_v42 = vpop.f32.mrb[3].mxu1  ;;  %1847 = vmatprep.subr.bf16.mxu1 %v4739_v2 }
  0xde   :  { %17 = vsyncpa [#allocation3], 0  ;;  %v4414_v7 = vld [vmem:[%s6177_s4 + $0x28] sm:$0xff]   ;;  %v4415_v43 = vld [vmem:[%s6177_s4 + $0x98] sm:$0xff]   ;;  %v251_v53 = vlaneseq  ;;  %vm3572_vm1 = vcmask 326656   ;;  %vm1954_vm2 = vcmask 1041408  }
  0xdf   :  { %4026 = vmatpush3.bf16.msra.mxu0 %v4414_v7  ;;  %v4416_v44 = vld [vmem:[%s6177_s4 + $0x70] sm:$0xff]   ;;  %v4418_v46 = vld [vmem:[%s6177_s4 + $0xa0] sm:$0xff]   ;;  %v4419_v47 = vld [vmem:[%s6177_s4 + $0x78] sm:$0xff]   ;;  %vm1950_vm3 = vcmask 162816  }
  0xe0   :  { %1848 = vmatpush1.bf16.msra.mxu1 %v4415_v43  ;;  %v4417_v45 = vld [vmem:[%s6177_s4 + $0x30] sm:$0xff]   ;;  %4027 = vmatprep.subr.bf16.mxu0 %v4416_v44  ;;  %v4420_v48 = vld [vmem:[%s6177_s4 + $0x38] sm:$0xff]   ;;  %v4421_v49 = vld [vmem:[%s6177_s4 + $0xa8] sm:$0xff]   ;;  %v5503_v54 = vshrl.u32 %v251_v53, 7 }
  0xe1   :  { %1849 = vmatprep.subr.bf16.mxu1 %v4739_v2  ;;  %v4422_v50 = vld [vmem:[%s6177_s4 + $0xb0] sm:$0xff]   ;;  %v4423_v51 = vld [vmem:[%s6177_s4 + $0xb8] sm:$0xff]   ;;  %v4424_v52 = vld [vmem:[%s6177_s4 + $0xc0] sm:$0xff]  }
  0xe2   :  { %v5506_v55 = vsub.s32 0, %v5503_v54  ;;  %v249_v56 = vld [vmem:[%s6176_s3] sm:$0xf]  ;;  %v5512_v57 = vsub.s32 1, %v5503_v54  ;;  %v5517_v10 = vsub.s32 2, %v5503_v54  ;;  %v5520_v11 = vsub.s32 3, %v5503_v54 }
  0xe3   :  { %4028 = vmatpush3.bf16.msra.mxu0 %v4417_v45  ;;  %v4425_v24 = vld [vmem:[%s6179_s6] ss:$16 sps:$4 sm:$0xff]   ;;  %v4427_v25 = vld [vmem:[%s6179_s6 + $0x4] ss:$16 sps:$4 sm:$0xff]   ;;  %v4432_v43 = vld [vmem:[%s6179_s6 + $0xc] ss:$16 sps:$4 sm:$0xff]  }
  0xe4   :  { %1850 = vmatpush1.bf16.msra.mxu1 %v4418_v46  ;;  %4029 = vmatprep.subr.bf16.mxu0 %v4419_v47  ;;  %v254_v58 = vrot.slane %v249_v56, %v5506_v55  ;;  %v258_v59 = vrot.slane %v249_v56, %v5512_v57  ;;  %v262_v12 = vrot.slane %v249_v56, %v5517_v10  ;;  %v3790_v31 = vld [vmem:[%s6178_s5] ss:$0 sm:$0xff]  ;;  %v4443_v47 = vld [vmem:[%s6181_s8 + $0x3c] ss:$28 sps:$4 sm:$0xff]  }
  0xe5   :  { %1851 = vmatprep.subr.bf16.mxu1 %v4739_v2  ;;  %v266_v13 = vrot.slane %v249_v56, %v5520_v11  ;;  %v4435_v45 = vld [vmem:[%s6181_s8] ss:$28 sps:$4 sm:$0xff]  }
  0xe6   :  { %v4437_v46 = vld [vmem:[%s6181_s8 + $0x4] ss:$28 sps:$4 sm:$0xff]  }
  0xe7   :  { %4030 = vmatpush3.bf16.msra.mxu0 %v4420_v48  ;;  %v4441_v48 = vld [vmem:[%s6181_s8 + $0x38] ss:$28 sps:$4 sm:$0xff]   ;;  %v4461_v53 = vld [vmem:[%s6181_s8 + $0xe4] ss:$28 sps:$4 sm:$0xff]  }
  0xe8   :  { %1852 = vmatpush1.bf16.msra.mxu1 %v4421_v49  ;;  %3197 = vmatprep.subr.bf16.mxu0 %v4437_v46  ;;  %v4449_v49 = vld [vmem:[%s6181_s8 + $0x74] ss:$28 sps:$4 sm:$0xff]   ;;  %v4459_v56 = vld [vmem:[%s6181_s8 + $0xe0] ss:$28 sps:$4 sm:$0xff]  }
  0xe9   :  { %1853 = vmatprep.subr.bf16.mxu1 %v4739_v2  ;;  %v4498_v46 = vld [vmem:[%s6181_s8 + $0x238] ss:$28 sps:$4 sm:$0xff]  }
  0xec   :  { %1854 = vmatpush1.bf16.msra.mxu1 %v4422_v50  ;;  %v4447_v50 = vld [vmem:[%s6181_s8 + $0x70] ss:$28 sps:$4 sm:$0xff]  }
  0xed   :  { %1855 = vmatprep.subr.bf16.mxu1 %v4739_v2 }
  0xf0   :  { %1856 = vmatpush1.bf16.msra.mxu1 %v4423_v51  ;;  %v4455_v51 = vld [vmem:[%s6181_s8 + $0xac] ss:$28 sps:$4 sm:$0xff]  }
  0xf1   :  { %1857 = vmatprep.subr.bf16.mxu1 %v4739_v2 }
  0xf4   :  { %1858 = vmatpush1.bf16.msra.mxu1 %v4424_v52  ;;  %v4453_v52 = vld [vmem:[%s6181_s8 + $0xa8] ss:$28 sps:$4 sm:$0xff]  }
  0xf5   :  { %1967 = vmatprep.subr.bf16.mxu1 %v4427_v25 }
 0x195   :  { %v1371_v60 = vpop.f32.mrb[0].mxu0 }
 0x196   :  { %v4059_v61 = vadd.f32 %v1371_v60, %v254_v58  ;;  %v1373_v62 = vpop.f32.mrb[1].mxu0  ;;  %v4467_v58 = vld [vmem:[%s6181_s8 + $0x11c] ss:$28 sps:$4 sm:$0xff]   ;;  %v4473_v60 = vld [vmem:[%s6181_s8 + $0x154] ss:$28 sps:$4 sm:$0xff]  }
 0x197   :  { %v4061_v63 = vadd.f32 %v1373_v62, %v258_v59  ;;  %v1375_v0 = vpop.f32.mrb[2].mxu0  ;;  %v4465_v59 = vld [vmem:[%s6181_s8 + $0x118] ss:$28 sps:$4 sm:$0xff]   ;;  %v4479_v62 = vld [vmem:[%s6181_s8 + $0x18c] ss:$28 sps:$4 sm:$0xff]  }
 0x198   :  { %v4060_v1 = vadd.f32 %v4059_v61, %v1412_v39  ;;  %v1376_v3 = vpop.f32.mrb[3].mxu0  ;;  %v1896_v39 = vld [vmem:[%s6179_s6 + $0x20] sm:$0x33]  ;;  %v4471_v61 = vld [vmem:[%s6181_s8 + $0x150] ss:$28 sps:$4 sm:$0xff]  }
 0x199   :  { %v4062_v4 = vadd.f32 %v4061_v63, %v1414_v40  ;;  %v3822_v41 = vcombine.high %v1896_v39, %v1896_v39  ;;  %v3821_v42 = vcombine.low %v1896_v39, %v1896_v39  ;;  %v4477_v63 = vld [vmem:[%s6181_s8 + $0x188] ss:$28 sps:$4 sm:$0xff]   ;;  %v4491_v3 = vld [vmem:[%s6181_s8 + $0x1fc] ss:$28 sps:$4 sm:$0xff]  }
 0x19a   :  { %v1583_v5 = vmax.f32 %v4060_v1, 0.0  ;;  %v4485_v0 = vld [vmem:[%s6181_s8 + $0x1c4] ss:$28 sps:$4 sm:$0xff]   ;;  %v4474_v39 = vld [vmem:[%s6181_s8 + $0x158] ss:$28 sps:$4 sm:$0xff]  }
 0x19b   :  { %v1584_v6 = vmax.f32 %v4062_v4, 0.0  ;;  %v1956_v7 = vsel %vm1954_vm2, %v3821_v42, 0  ;;  %v4483_v1 = vld [vmem:[%s6181_s8 + $0x1c0] ss:$28 sps:$4 sm:$0xff]   ;;  %v4489_v4 = vld [vmem:[%s6181_s8 + $0x1f8] ss:$28 sps:$4 sm:$0xff]  }
 0x19c   :  { %v1587_v9 = vpack.c.bf16 %v1583_v5, %v1583_v5  ;;  %v4497_v5 = vld [vmem:[%s6181_s8 + $0x234] ss:$28 sps:$4 sm:$0xff]   ;;  %v4488_v42 = vld [vmem:[%s6181_s8 + $0x1cc] ss:$28 sps:$4 sm:$0xff]  }
 0x19d   :  { %v1588_v8 = vpack.c.bf16 %v1584_v6, %v1584_v6  ;;  %v4495_v6 = vld [vmem:[%s6181_s8 + $0x230] ss:$28 sps:$4 sm:$0xff]  }
 0x19f   :  { %1833 = vmatprep.mubr.bf16.mxu0 %v1588_v8  ;;  %v4503_v8 = vld [vmem:[%s6181_s8 + $0x26c] ss:$28 sps:$4 sm:$0xff]  }
 0x1a0   :  { %1834 = vmatmul.mubr.bf16.vlgmr.msra.gmra.mrb[4].mxu0 %v1587_v9  ;;  %v4501_v9 = vld [vmem:[%s6181_s8 + $0x268] ss:$28 sps:$4 sm:$0xff]  }
 0x1a1   :  { %3198 = vmatpush1.bf16.msra.mxu0 %v4435_v45  ;;  %v4500_v45 = vld [vmem:[%s6181_s8 + $0x23c] ss:$28 sps:$4 sm:$0xff]  }
 0x1a2   :  { %3199 = vmatprep.subr.bf16.mxu0 %v4443_v47  ;;  %v4506_v47 = vld [vmem:[%s6181_s8 + $0x274] ss:$28 sps:$4 sm:$0xff]  }
 0x1a5   :  { %3200 = vmatpush1.bf16.msra.mxu0 %v4441_v48  ;;  %v4504_v48 = vld [vmem:[%s6181_s8 + $0x270] ss:$28 sps:$4 sm:$0xff]  }
 0x1a6   :  { %v1576_v14 = vpop.f32.mrb[4].mxu1  ;;  %3201 = vmatprep.subr.bf16.mxu0 %v4449_v49  ;;  %v4512_v49 = vld [vmem:[%s6181_s8 + $0x2ac] ss:$28 sps:$4 sm:$0xff]  }
 0x1a7   :  { %v4063_v15 = vadd.f32 %v1576_v14, %v262_v12  ;;  %v1578_v16 = vpop.f32.mrb[5].mxu1  ;;  %v4509_v12 = vld [vmem:[%s6181_s8 + $0x2a4] ss:$28 sps:$4 sm:$0xff]   ;;  %v4515_v14 = vld [vmem:[%s6181_s8 + $0x2dc] ss:$28 sps:$4 sm:$0xff]  }
 0x1a8   :  { %v4064_v17 = vadd.f32 %v1578_v16, %v266_v13  ;;  %v1580_v18 = vpop.f32.mrb[6].mxu1  ;;  %v4507_v13 = vld [vmem:[%s6181_s8 + $0x2a0] ss:$28 sps:$4 sm:$0xff]  }
 0x1a9   :  { %v1585_v19 = vmax.f32 %v4063_v15, 0.0  ;;  %v1581_v20 = vpop.f32.mrb[7].mxu1  ;;  %3202 = vmatpush1.bf16.msra.mxu0 %v4447_v50  ;;  %v4513_v15 = vld [vmem:[%s6181_s8 + $0x2d8] ss:$28 sps:$4 sm:$0xff]   ;;  %v1884_v16 = vld [vmem:[%s6174_s1] sm:$0xff] }
 0x1aa   :  { %v1586_v21 = vmax.f32 %v4064_v17, 0.0  ;;  %3203 = vmatprep.subr.bf16.mxu0 %v4455_v51  ;;  %v4510_v50 = vld [vmem:[%s6181_s8 + $0x2a8] ss:$28 sps:$4 sm:$0xff]  }
 0x1ab   :  { %v1589_v23 = vpack.c.bf16 %v1585_v19, %v1585_v19  ;;  %v1897_v19 = vld [vmem:[%s6179_s6 + $0x28] sm:$0x33]  ;;  %v4518_v51 = vld [vmem:[%s6181_s8 + $0x2e4] ss:$28 sps:$4 sm:$0xff]  }
 0x1ac   :  { %v1590_v22 = vpack.c.bf16 %v1586_v21, %v1586_v21  ;;  %v4430_v21 = vld [vmem:[%s6179_s6 + $0x8] ss:$16 sps:$4 sm:$0xff]  }
 0x1ad   :  { %3204 = vmatpush1.bf16.msra.mxu0 %v4453_v52  ;;  %v4516_v52 = vld [vmem:[%s6181_s8 + $0x2e0] ss:$28 sps:$4 sm:$0xff]  }
 0x1ae   :  { %3816 = vmatprep.mubr.msk.bf16.mxu1 %vm1251_vm0, %v1590_v22  ;;  %3205 = vmatprep.subr.bf16.mxu0 %v4461_v53  ;;  %v4521_v53 = vld [vmem:[%s6181_s8 + $0x314] ss:$28 sps:$4 sm:$0xff]  }
 0x1af   :  { %1874 = vmatmul.mubr.bf16.vlgmr.msra.gmra.mrb[8].mxu1 %v1589_v23  ;;  %v3824_v23 = vcombine.high %v1897_v19, %v1897_v19 }
 0x1b0   :  { %1999 = vmatprep.mubr.bf16.mxu1 %v4739_v2  ;;  %1968 = vmatpush1.bf16.msra.mxu1 %v4425_v24  ;;  %v3823_v24 = vcombine.low %v1897_v19, %v1897_v19  ;;  %v4534_v19 = vld [vmem:[%s6181_s8 + $0x388] ss:$28 sps:$4 sm:$0xff]  }
 0x1b1   :  { %3825 = vmatprep.subr.msk.bf16.mxu1 %vm1954_vm2, %v3822_v41  ;;  %3206 = vmatpush1.bf16.msra.mxu0 %v4459_v56  ;;  %v4480_v41 = vld [vmem:[%s6181_s8 + $0x190] ss:$28 sps:$4 sm:$0xff]   ;;  %v4524_v56 = vld [vmem:[%s6181_s8 + $0x31c] ss:$28 sps:$4 sm:$0xff]  }
 0x1b2   :  { %3207 = vmatprep.subr.bf16.mxu0 %v4467_v58  ;;  %v1962_v25 = vsel %vm1954_vm2, %v3823_v24, 0  ;;  %v4519_v58 = vld [vmem:[%s6181_s8 + $0x310] ss:$28 sps:$4 sm:$0xff]  }
 0x1b4   :  { %1970 = vmatpush1.bf16.msra.mxu1 %v1956_v7  ;;  %v4486_v7 = vld [vmem:[%s6181_s8 + $0x1c8] ss:$28 sps:$4 sm:$0xff]  }
 0x1b5   :  { %2008 = vmatprep.subr.bf16.mxu1 %v4432_v43  ;;  %3208 = vmatpush1.bf16.msra.mxu0 %v4465_v59  ;;  %v4494_v43 = vld [vmem:[%s6181_s8 + $0x204] ss:$28 sps:$4 sm:$0xff]   ;;  %v4522_v59 = vld [vmem:[%s6181_s8 + $0x318] ss:$28 sps:$4 sm:$0xff]  }
 0x1b6   :  { %3209 = vmatprep.subr.bf16.mxu0 %v4473_v60  ;;  %v4527_v60 = vld [vmem:[%s6181_s8 + $0x34c] ss:$28 sps:$4 sm:$0xff]  }
 0x1b9   :  { %3210 = vmatpush1.bf16.msra.mxu0 %v4471_v61  ;;  %v4530_v61 = vld [vmem:[%s6181_s8 + $0x354] ss:$28 sps:$4 sm:$0xff]  }
 0x1ba   :  { %3211 = vmatprep.subr.bf16.mxu0 %v4479_v62  ;;  %v4525_v62 = vld [vmem:[%s6181_s8 + $0x348] ss:$28 sps:$4 sm:$0xff]  }
 0x1bd   :  { %3212 = vmatpush1.bf16.msra.mxu0 %v4477_v63  ;;  %v4528_v63 = vld [vmem:[%s6181_s8 + $0x350] ss:$28 sps:$4 sm:$0xff]  }
 0x1be   :  { %3213 = vmatprep.subr.bf16.mxu0 %v4485_v0  ;;  %v4533_v0 = vld [vmem:[%s6181_s8 + $0x384] ss:$28 sps:$4 sm:$0xff]  }
 0x1c1   :  { %3214 = vmatpush1.bf16.msra.mxu0 %v4483_v1  ;;  %v4536_v1 = vld [vmem:[%s6181_s8 + $0x38c] ss:$28 sps:$4 sm:$0xff]  }
 0x1c2   :  { %3215 = vmatprep.subr.bf16.mxu0 %v4491_v3  ;;  %v5764_v3 = vld [vmem:[%s6180_s7] sm:$0xf] }
 0x1c5   :  { %3216 = vmatpush1.bf16.msra.mxu0 %v4489_v4  ;;  %v1903_v4 = vrot.slane %v5764_v3, %v5506_v55 }
 0x1c6   :  { %3217 = vmatprep.subr.bf16.mxu0 %v4497_v5  ;;  %v1907_v5 = vrot.slane %v5764_v3, %v5512_v57 }
 0x1c9   :  { %3218 = vmatpush1.bf16.msra.mxu0 %v4495_v6 }
 0x1ca   :  { %3219 = vmatprep.subr.bf16.mxu0 %v4503_v8 }
 0x1cd   :  { %3220 = vmatpush1.bf16.msra.mxu0 %v4501_v9 }
 0x1ce   :  { %3221 = vmatprep.subr.bf16.mxu0 %v4509_v12 }
 0x1d1   :  { %3222 = vmatpush1.bf16.msra.mxu0 %v4507_v13 }
 0x1d2   :  { %3223 = vmatprep.subr.bf16.mxu0 %v4515_v14 }
 0x1d5   :  { %3224 = vmatpush1.bf16.msra.mxu0 %v4513_v15 }
 0x1d6   :  { %3225 = vmatprep.subr.bf16.mxu0 %v4521_v53  ;;  %v4575_v53 = vld [vmem:[%s6181_s8 + $0x50c] ss:$28 sps:$4 sm:$0xff]  }
 0x1d9   :  { %3226 = vmatpush1.bf16.msra.mxu0 %v4519_v58  ;;  %v4573_v58 = vld [vmem:[%s6181_s8 + $0x508] ss:$28 sps:$4 sm:$0xff]  }
 0x1da   :  { %3227 = vmatprep.subr.bf16.mxu0 %v4527_v60 }
 0x1dd   :  { %3228 = vmatpush1.bf16.msra.mxu0 %v4525_v62  ;;  %v4584_v62 = vld [vmem:[%s6181_s8 + $0x54c] ss:$28 sps:$4 sm:$0xff]  }
 0x1de   :  { %3238 = vmatprep.subr.bf16.mxu0 %v4533_v0  ;;  %v4582_v0 = vld [vmem:[%s6181_s8 + $0x548] ss:$28 sps:$4 sm:$0xff]  }
 0x273   :  { %v4031_v26 = vpop.f32.mrb[4].mxu0 }
 0x274   :  { %v4032_v27 = vpop.f32.mrb[5].mxu0 }
 0x275   :  { %v4033_v28 = vadd.f32 %v4032_v27, %v4031_v26  ;;  %v4034_v29 = vpop.f32.mrb[6].mxu0  ;;  %v4440_v26 = vld [vmem:[%s6181_s8 + $0xc] ss:$28 sps:$4 sm:$0xff]  }
 0x276   :  { %v4035_v30 = vpop.f32.mrb[7].mxu0  ;;  %v4438_v27 = vld [vmem:[%s6181_s8 + $0x8] ss:$28 sps:$4 sm:$0xff]   ;;  %v4444_v29 = vld [vmem:[%s6181_s8 + $0x40] ss:$28 sps:$4 sm:$0xff]  }
 0x277   :  { %v1836_v32 = vadd.f32 %v4033_v28, %v3790_v31  ;;  %v4446_v28 = vld [vmem:[%s6181_s8 + $0x44] ss:$28 sps:$4 sm:$0xff]   ;;  %v4452_v30 = vld [vmem:[%s6181_s8 + $0x7c] ss:$28 sps:$4 sm:$0xff]  }
 0x278   :  { %v4450_v31 = vld [vmem:[%s6181_s8 + $0x78] ss:$28 sps:$4 sm:$0xff]  }
 0x282   :  { %v1875_v33 = vpop.f32.mrb[8].mxu1 }
 0x283   :  { %v5535_v34 = vadd.f32 %v1875_v33, %v1836_v32  ;;  %v1877_v35 = vpop.f32.mrb[9].mxu1  ;;  %v4458_v32 = vld [vmem:[%s6181_s8 + $0xb4] ss:$28 sps:$4 sm:$0xff]  }
 0x284   :  { %v1878_v36 = vpop.f32.mrb[10].mxu1  ;;  %v4456_v33 = vld [vmem:[%s6181_s8 + $0xb0] ss:$28 sps:$4 sm:$0xff]   ;;  %v4462_v35 = vld [vmem:[%s6181_s8 + $0xe8] ss:$28 sps:$4 sm:$0xff]  }
 0x285   :  { %v1881_v37 = vmul.f32 0.5, %v5535_v34  ;;  %3573 = vst.msk [vmem:[%s6184_s11] sm:$0xff] %vm3572_vm1, %v5535_v34  ;;  %v1879_v38 = vpop.f32.mrb[11].mxu1  ;;  %s4740_s11 = smov 108   ;;  %v4470_v36 = vld [vmem:[%s6181_s8 + $0x124] ss:$28 sps:$4 sm:$0xff]  }
 0x286   :  { %v4476_v38 = vld [vmem:[%s6181_s8 + $0x15c] ss:$28 sps:$4 sm:$0xff]  }
 0x287   :  { %v1882_v40 = vmul.f32 1.442695, %v1881_v37  ;;  %v4468_v37 = vld [vmem:[%s6181_s8 + $0x120] ss:$28 sps:$4 sm:$0xff]  }
 0x289   :  { %4685 = vpow2.f32 %v1882_v40  ;;  %v4482_v40 = vld [vmem:[%s6181_s8 + $0x194] ss:$28 sps:$4 sm:$0xff]  }
 0x293   :  { %v4686_v44 = vpop.eup %4685 }
 0x294   :  { %1886 = vrot.lane.b32.xlu0 %v4686_v44, %s4740_s11  ;;  %v4492_v44 = vld [vmem:[%s6181_s8 + $0x200] ss:$28 sps:$4 sm:$0xff]  }
 0x306   :  { %v1887_v17 = vpop.permute.xlu0 %1886 }
 0x307   :  { %v1889_v18 = vmul.f32 %v1887_v17, %v1884_v16 }
 0x309   :  { %v1890_v20 = vadd.f32 %v1889_v18, %v5535_v34  ;;  %v4464_v34 = vld [vmem:[%s6181_s8 + $0xec] ss:$28 sps:$4 sm:$0xff]   ;;  %v4531_v18 = vld [vmem:[%s6181_s8 + $0x380] ss:$28 sps:$4 sm:$0xff]  }
 0x30b   :  { %v1891_v22 = vpack.c.bf16 %v1890_v20, %v1890_v20  ;;  %v1915_v20 = vrot.slane %v5764_v3, %v5520_v11 }
 0x30d   :  { %3826 = vmatmul.mubr.msk.bf16.vlgmr.msra.gmra.mrb[12].mxu1 %vm1950_vm3, %v1891_v22 }
 0x30e   :  { %2009 = vmatpush1.bf16.msra.mxu1 %v4430_v21  ;;  %2040 = vmatprep.mubr.bf16.mxu1 %v4739_v2 }
 0x30f   :  { %3827 = vmatprep.subr.msk.bf16.mxu1 %vm1954_vm2, %v3824_v23  ;;  %v4542_v23 = vld [vmem:[%s6181_s8 + $0x3c4] ss:$28 sps:$4 sm:$0xff]  }
 0x312   :  { %2011 = vmatpush1.bf16.msra.mxu1 %v1962_v25 }
 0x313   :  { %3279 = vmatprep.subr.bf16.mxu1 %v4440_v26 }
 0x315   :  { %3828 = vmatmul.mubr.msk.bf16.vlgmr.msra.gmra.mrb[16].mxu1 %vm1950_vm3, %v1891_v22  ;;  %v4539_v22 = vld [vmem:[%s6181_s8 + $0x3bc] ss:$28 sps:$4 sm:$0xff]  }
 0x316   :  { %3280 = vmatpush1.bf16.msra.mxu1 %v4438_v27 }
 0x317   :  { %3281 = vmatprep.subr.bf16.mxu1 %v4446_v28  ;;  %v4537_v28 = vld [vmem:[%s6181_s8 + $0x3b8] ss:$28 sps:$4 sm:$0xff]  }
 0x31a   :  { %3282 = vmatpush1.bf16.msra.mxu1 %v4444_v29  ;;  %v4540_v29 = vld [vmem:[%s6181_s8 + $0x3c0] ss:$28 sps:$4 sm:$0xff]  }
 0x31b   :  { %3283 = vmatprep.subr.bf16.mxu1 %v4452_v30 }
 0x31e   :  { %3284 = vmatpush1.bf16.msra.mxu1 %v4450_v31  ;;  %v4545_v31 = vld [vmem:[%s6181_s8 + $0x3f4] ss:$28 sps:$4 sm:$0xff]  }
 0x31f   :  { %3285 = vmatprep.subr.bf16.mxu1 %v4458_v32  ;;  %v4548_v32 = vld [vmem:[%s6181_s8 + $0x3fc] ss:$28 sps:$4 sm:$0xff]  }
 0x322   :  { %3286 = vmatpush1.bf16.msra.mxu1 %v4456_v33 }
 0x323   :  { %3287 = vmatprep.subr.bf16.mxu1 %v4464_v34 }
 0x326   :  { %3288 = vmatpush1.bf16.msra.mxu1 %v4462_v35  ;;  %v4543_v35 = vld [vmem:[%s6181_s8 + $0x3f0] ss:$28 sps:$4 sm:$0xff]  }
 0x327   :  { %3289 = vmatprep.subr.bf16.mxu1 %v4470_v36  ;;  %v4546_v36 = vld [vmem:[%s6181_s8 + $0x3f8] ss:$28 sps:$4 sm:$0xff]  }
 0x32a   :  { %3290 = vmatpush1.bf16.msra.mxu1 %v4468_v37  ;;  %v4551_v37 = vld [vmem:[%s6181_s8 + $0x42c] ss:$28 sps:$4 sm:$0xff]  }
 0x32b   :  { %3291 = vmatprep.subr.bf16.mxu1 %v4476_v38  ;;  %v4554_v38 = vld [vmem:[%s6181_s8 + $0x434] ss:$28 sps:$4 sm:$0xff]  }
 0x32e   :  { %3292 = vmatpush1.bf16.msra.mxu1 %v4474_v39  ;;  %v4549_v39 = vld [vmem:[%s6181_s8 + $0x428] ss:$28 sps:$4 sm:$0xff]  }
 0x32f   :  { %3293 = vmatprep.subr.bf16.mxu1 %v4482_v40  ;;  %v4552_v40 = vld [vmem:[%s6181_s8 + $0x430] ss:$28 sps:$4 sm:$0xff]  }
 0x332   :  { %3294 = vmatpush1.bf16.msra.mxu1 %v4480_v41  ;;  %v4557_v41 = vld [vmem:[%s6181_s8 + $0x464] ss:$28 sps:$4 sm:$0xff]  }
 0x333   :  { %3295 = vmatprep.subr.bf16.mxu1 %v4488_v42  ;;  %v4560_v42 = vld [vmem:[%s6181_s8 + $0x46c] ss:$28 sps:$4 sm:$0xff]  }
 0x336   :  { %3296 = vmatpush1.bf16.msra.mxu1 %v4486_v7  ;;  %v4555_v7 = vld [vmem:[%s6181_s8 + $0x460] ss:$28 sps:$4 sm:$0xff]  }
 0x337   :  { %3297 = vmatprep.subr.bf16.mxu1 %v4494_v43  ;;  %v4558_v43 = vld [vmem:[%s6181_s8 + $0x468] ss:$28 sps:$4 sm:$0xff]  }
 0x33a   :  { %3298 = vmatpush1.bf16.msra.mxu1 %v4492_v44  ;;  %v4563_v44 = vld [vmem:[%s6181_s8 + $0x49c] ss:$28 sps:$4 sm:$0xff]  }
 0x33b   :  { %3299 = vmatprep.subr.bf16.mxu1 %v4500_v45  ;;  %v4566_v45 = vld [vmem:[%s6181_s8 + $0x4a4] ss:$28 sps:$4 sm:$0xff]  }
 0x33e   :  { %3300 = vmatpush1.bf16.msra.mxu1 %v4498_v46  ;;  %v4561_v46 = vld [vmem:[%s6181_s8 + $0x498] ss:$28 sps:$4 sm:$0xff]  }
 0x33f   :  { %3301 = vmatprep.subr.bf16.mxu1 %v4506_v47  ;;  %v4564_v47 = vld [vmem:[%s6181_s8 + $0x4a0] ss:$28 sps:$4 sm:$0xff]  }
 0x342   :  { %3302 = vmatpush1.bf16.msra.mxu1 %v4504_v48  ;;  %v4569_v48 = vld [vmem:[%s6181_s8 + $0x4d4] ss:$28 sps:$4 sm:$0xff]  }
 0x343   :  { %3303 = vmatprep.subr.bf16.mxu1 %v4512_v49  ;;  %v4572_v49 = vld [vmem:[%s6181_s8 + $0x4dc] ss:$28 sps:$4 sm:$0xff]  }
 0x346   :  { %3304 = vmatpush1.bf16.msra.mxu1 %v4510_v50  ;;  %v4567_v50 = vld [vmem:[%s6181_s8 + $0x4d0] ss:$28 sps:$4 sm:$0xff]  }
 0x347   :  { %3305 = vmatprep.subr.bf16.mxu1 %v4518_v51  ;;  %v4570_v51 = vld [vmem:[%s6181_s8 + $0x4d8] ss:$28 sps:$4 sm:$0xff]  }
 0x34a   :  { %3306 = vmatpush1.bf16.msra.mxu1 %v4516_v52  ;;  %v1911_v52 = vrot.slane %v5764_v3, %v5517_v10  ;;  %v4587_v3 = vld [vmem:[%s6181_s8 + $0x14] ss:$28 sps:$4 sm:$0xff]  }
 0x34b   :  { %3307 = vmatprep.subr.bf16.mxu1 %v4524_v56  ;;  %v4578_v56 = vld [vmem:[%s6181_s8 + $0x514] ss:$28 sps:$4 sm:$0xff]  }
 0x34e   :  { %3308 = vmatpush1.bf16.msra.mxu1 %v4522_v59  ;;  %v4576_v59 = vld [vmem:[%s6181_s8 + $0x510] ss:$28 sps:$4 sm:$0xff]  }
 0x34f   :  { %3309 = vmatprep.subr.bf16.mxu1 %v4530_v61  ;;  %v4581_v61 = vld [vmem:[%s6181_s8 + $0x544] ss:$28 sps:$4 sm:$0xff]  }
 0x352   :  { %3310 = vmatpush1.bf16.msra.mxu1 %v4528_v63  ;;  %v4579_v63 = vld [vmem:[%s6181_s8 + $0x540] ss:$28 sps:$4 sm:$0xff]  }
 0x353   :  { %3320 = vmatprep.subr.bf16.mxu1 %v4536_v1 }
 0x3e0   :  { %v2001_v6 = vpop.f32.mrb[12].mxu1 }
 0x3e1   :  { %v2002_v8 = vadd.f32 %v2001_v6, %v1903_v4  ;;  %v2003_v9 = vpop.f32.mrb[13].mxu1  ;;  %v4588_v4 = vld [vmem:[%s6181_s8 + $0x1d8] ss:$28 sps:$4 sm:$0xff]  }
 0x3e2   :  { %v2004_v12 = vadd.f32 %v2003_v9, %v1907_v5  ;;  %v2005_v13 = vpop.f32.mrb[14].mxu1  ;;  %v4585_v5 = vld [vmem:[%s6181_s8 + $0x10] ss:$28 sps:$4 sm:$0xff]  }
 0x3e3   :  { %v2049_v14 = vmax.f32 %v2002_v8, 0.0  ;;  %v2006_v15 = vpop.f32.mrb[15].mxu1  ;;  %v4589_v8 = vld [vmem:[%s6181_s8 + $0x18] ss:$28 sps:$4 sm:$0xff]   ;;  %v4592_v9 = vld [vmem:[%s6181_s8 + $0x4c] ss:$28 sps:$4 sm:$0xff]  }
 0x3e4   :  { %v2050_v16 = vmax.f32 %v2004_v12, 0.0  ;;  %v4593_v12 = vld [vmem:[%s6181_s8 + $0x210] ss:$28 sps:$4 sm:$0xff]   ;;  %v4590_v13 = vld [vmem:[%s6181_s8 + $0x48] ss:$28 sps:$4 sm:$0xff]  }
 0x3e5   :  { %v5780_v21 = vpack.c.bf16 %v2049_v14, %v2049_v14  ;;  %v4594_v14 = vld [vmem:[%s6181_s8 + $0x50] ss:$28 sps:$4 sm:$0xff]   ;;  %v4597_v15 = vld [vmem:[%s6181_s8 + $0x84] ss:$28 sps:$4 sm:$0xff]  }
 0x3e6   :  { %v5770_v17 = vpack.c.bf16 %v2050_v16, %v2050_v16  ;;  %v4598_v16 = vld [vmem:[%s6181_s8 + $0x248] ss:$28 sps:$4 sm:$0xff]  }
 0x3e8   :  { %v5788_v24 = vpop.f32.mrb[16].mxu1  ;;  %3229 = vmatprep.mubr.bf16.mxu0 %v5770_v17  ;;  %3311 = vmatprep.mubr.bf16.mxu1 %v5770_v17 }
 0x3e9   :  { %v2044_v25 = vpop.f32.mrb[17].mxu1  ;;  %3230 = vmatmul.mubr.bf16.vlgmr.msra.gmra.mrb[8].mxu0 %v5780_v21  ;;  %3312 = vmatmul.mubr.bf16.vlgmr.msra.gmra.mrb[20].mxu1 %v5780_v21  ;;  %v2043_v60 = vadd.f32 %v5788_v24, %v1911_v52  ;;  %v4607_v24 = vld [vmem:[%s6181_s8 + $0xf4] ss:$28 sps:$4 sm:$0xff]  }
 0x3ea   :  { %v2045_v26 = vadd.f32 %v2044_v25, %v1915_v20  ;;  %3239 = vmatpush1.bf16.msra.mxu0 %v4531_v18  ;;  %3321 = vmatpush1.bf16.msra.mxu1 %v4534_v19  ;;  %v2046_v27 = vpop.f32.mrb[18].mxu1  ;;  %v4595_v18 = vld [vmem:[%s6181_s8 + $0x80] ss:$28 sps:$4 sm:$0xff]   ;;  %v4608_v25 = vld [vmem:[%s6181_s8 + $0x2b8] ss:$28 sps:$4 sm:$0xff]  }
 0x3eb   :  { %v2047_v30 = vpop.f32.mrb[19].mxu1  ;;  %3240 = vmatprep.subr.bf16.mxu0 %v4539_v22  ;;  %3322 = vmatprep.subr.bf16.mxu1 %v4542_v23  ;;  %v2051_v1 = vmax.f32 %v2043_v60, 0.0  ;;  %v4602_v19 = vld [vmem:[%s6181_s8 + $0xbc] ss:$28 sps:$4 sm:$0xff]   ;;  %v4643_v52 = vld [vmem:[%s6181_s8 + $0x2b4] ss:$28 sps:$4 sm:$0xff]  }
 0x3ec   :  { %v2052_v33 = vmax.f32 %v2045_v26, 0.0  ;;  %v4603_v20 = vld [vmem:[%s6181_s8 + $0x280] ss:$28 sps:$4 sm:$0xff]   ;;  %v4600_v22 = vld [vmem:[%s6181_s8 + $0xb8] ss:$28 sps:$4 sm:$0xff]  }
 0x3ed   :  { %v5902_v6 = vpack.c.bf16 %v2051_v1, %v2051_v1  ;;  %v4604_v23 = vld [vmem:[%s6181_s8 + $0xc0] ss:$28 sps:$4 sm:$0xff]   ;;  %v4605_v26 = vld [vmem:[%s6181_s8 + $0xf0] ss:$28 sps:$4 sm:$0xff]   ;;  %v4609_v27 = vld [vmem:[%s6181_s8 + $0xf8] ss:$28 sps:$4 sm:$0xff]  }
 0x3ee   :  { %v5806_v34 = vpack.c.bf16 %v2052_v33, %v2052_v33  ;;  %3241 = vmatpush1.bf16.msra.mxu0 %v4537_v28  ;;  %3323 = vmatpush1.bf16.msra.mxu1 %v4540_v29  ;;  %v4612_v28 = vld [vmem:[%s6181_s8 + $0x12c] ss:$28 sps:$4 sm:$0xff]   ;;  %v4653_v1 = vld [vmem:[%s6181_s8 + $0x358] ss:$28 sps:$4 sm:$0xff]  }
 0x3ef   :  { %3242 = vmatprep.subr.bf16.mxu0 %v4545_v31  ;;  %3324 = vmatprep.subr.bf16.mxu1 %v4548_v32  ;;  %v4613_v29 = vld [vmem:[%s6181_s8 + $0x2f0] ss:$28 sps:$4 sm:$0xff]   ;;  %v4610_v30 = vld [vmem:[%s6181_s8 + $0x128] ss:$28 sps:$4 sm:$0xff]  }
 0x3f0   :  { %4004 = vmatprep.mubr.msk.bf16.mxu0 %vm1251_vm0, %v5806_v34  ;;  %4005 = vmatprep.mubr.msk.bf16.mxu1 %vm1251_vm0, %v5806_v34  ;;  %v4614_v31 = vld [vmem:[%s6181_s8 + $0x130] ss:$28 sps:$4 sm:$0xff]   ;;  %v4617_v32 = vld [vmem:[%s6181_s8 + $0x164] ss:$28 sps:$4 sm:$0xff]  }
 0x3f1   :  { %v4618_v33 = vld [vmem:[%s6181_s8 + $0x328] ss:$28 sps:$4 sm:$0xff]   ;;  %v4648_v60 = vld [vmem:[%s6181_s8 + $0x4b0] ss:$28 sps:$4 sm:$0xff]  }
 0x3f2   :  { %3243 = vmatpush1.bf16.msra.mxu0 %v4543_v35  ;;  %3325 = vmatpush1.bf16.msra.mxu1 %v4546_v36  ;;  %v4615_v35 = vld [vmem:[%s6181_s8 + $0x160] ss:$28 sps:$4 sm:$0xff]   ;;  %v4619_v36 = vld [vmem:[%s6181_s8 + $0x168] ss:$28 sps:$4 sm:$0xff]  }
 0x3f3   :  { %3244 = vmatprep.subr.bf16.mxu0 %v4551_v37  ;;  %3326 = vmatprep.subr.bf16.mxu1 %v4554_v38  ;;  %v4622_v37 = vld [vmem:[%s6181_s8 + $0x19c] ss:$28 sps:$4 sm:$0xff]  }
 0x3f4   :  { %v4623_v38 = vld [vmem:[%s6181_s8 + $0x360] ss:$28 sps:$4 sm:$0xff]  }
 0x3f6   :  { %3245 = vmatpush1.bf16.msra.mxu0 %v4549_v39  ;;  %3327 = vmatpush1.bf16.msra.mxu1 %v4552_v40  ;;  %v4620_v39 = vld [vmem:[%s6181_s8 + $0x198] ss:$28 sps:$4 sm:$0xff]   ;;  %v4624_v40 = vld [vmem:[%s6181_s8 + $0x1a0] ss:$28 sps:$4 sm:$0xff]  }
 0x3f7   :  { %3246 = vmatprep.subr.bf16.mxu0 %v4557_v41  ;;  %3328 = vmatprep.subr.bf16.mxu1 %v4560_v42  ;;  %v4627_v41 = vld [vmem:[%s6181_s8 + $0x1d4] ss:$28 sps:$4 sm:$0xff]  }
 0x3f8   :  { %v4625_v42 = vld [vmem:[%s6181_s8 + $0x1d0] ss:$28 sps:$4 sm:$0xff]  }
 0x3fa   :  { %3247 = vmatpush1.bf16.msra.mxu0 %v4555_v7  ;;  %3329 = vmatpush1.bf16.msra.mxu1 %v4558_v43  ;;  %v4628_v7 = vld [vmem:[%s6181_s8 + $0x398] ss:$28 sps:$4 sm:$0xff]   ;;  %v4631_v43 = vld [vmem:[%s6181_s8 + $0x20c] ss:$28 sps:$4 sm:$0xff]  }
 0x3fb   :  { %3248 = vmatprep.subr.bf16.mxu0 %v4563_v44  ;;  %3330 = vmatprep.subr.bf16.mxu1 %v4566_v45  ;;  %v4629_v44 = vld [vmem:[%s6181_s8 + $0x208] ss:$28 sps:$4 sm:$0xff]   ;;  %v4632_v45 = vld [vmem:[%s6181_s8 + $0x3d0] ss:$28 sps:$4 sm:$0xff]  }
 0x3fe   :  { %3249 = vmatpush1.bf16.msra.mxu0 %v4561_v46  ;;  %3331 = vmatpush1.bf16.msra.mxu1 %v4564_v47  ;;  %v4635_v46 = vld [vmem:[%s6181_s8 + $0x244] ss:$28 sps:$4 sm:$0xff]  }
 0x3ff   :  { %3250 = vmatprep.subr.bf16.mxu0 %v4569_v48  ;;  %3332 = vmatprep.subr.bf16.mxu1 %v4572_v49  ;;  %v4633_v47 = vld [vmem:[%s6181_s8 + $0x240] ss:$28 sps:$4 sm:$0xff]   ;;  %v4636_v48 = vld [vmem:[%s6181_s8 + $0x408] ss:$28 sps:$4 sm:$0xff]  }
 0x400   :  { %v4639_v49 = vld [vmem:[%s6181_s8 + $0x27c] ss:$28 sps:$4 sm:$0xff]  }
 0x402   :  { %3251 = vmatpush1.bf16.msra.mxu0 %v4567_v50  ;;  %3333 = vmatpush1.bf16.msra.mxu1 %v4570_v51  ;;  %v4637_v50 = vld [vmem:[%s6181_s8 + $0x278] ss:$28 sps:$4 sm:$0xff]   ;;  %v4640_v51 = vld [vmem:[%s6181_s8 + $0x440] ss:$28 sps:$4 sm:$0xff]  }
 0x403   :  { %3252 = vmatprep.subr.bf16.mxu0 %v4575_v53  ;;  %3334 = vmatprep.subr.bf16.mxu1 %v4578_v56  ;;  %v4641_v53 = vld [vmem:[%s6181_s8 + $0x2b0] ss:$28 sps:$4 sm:$0xff]   ;;  %v4644_v56 = vld [vmem:[%s6181_s8 + $0x478] ss:$28 sps:$4 sm:$0xff]  }
 0x406   :  { %3253 = vmatpush1.bf16.msra.mxu0 %v4573_v58  ;;  %3335 = vmatpush1.bf16.msra.mxu1 %v4576_v59  ;;  %v4647_v58 = vld [vmem:[%s6181_s8 + $0x2ec] ss:$28 sps:$4 sm:$0xff]  }
 0x407   :  { %3254 = vmatprep.subr.bf16.mxu0 %v4581_v61  ;;  %3336 = vmatprep.subr.bf16.mxu1 %v4584_v62  ;;  %v4645_v59 = vld [vmem:[%s6181_s8 + $0x2e8] ss:$28 sps:$4 sm:$0xff]   ;;  %v4649_v62 = vld [vmem:[%s6181_s8 + $0x320] ss:$28 sps:$4 sm:$0xff]  }
 0x408   :  { %v4651_v61 = vld [vmem:[%s6181_s8 + $0x324] ss:$28 sps:$4 sm:$0xff]  }
 0x40a   :  { %3255 = vmatpush1.bf16.msra.mxu0 %v4579_v63  ;;  %3337 = vmatpush1.bf16.msra.mxu1 %v4582_v0  ;;  %v4652_v63 = vld [vmem:[%s6181_s8 + $0x4e8] ss:$28 sps:$4 sm:$0xff]   ;;  %v4655_v0 = vld [vmem:[%s6181_s8 + $0x35c] ss:$28 sps:$4 sm:$0xff]  }
 0x40b   :  { %3361 = vmatprep.subr.bf16.mxu0 %v4587_v3  ;;  %4037 = vmatprep.subr.bf16.mxu1 %v4588_v4  ;;  %v4656_v3 = vld [vmem:[%s6181_s8 + $0x520] ss:$28 sps:$4 sm:$0xff]   ;;  %v4659_v4 = vld [vmem:[%s6181_s8 + $0x394] ss:$28 sps:$4 sm:$0xff]  }
 0x40d   :  { %3271 = vmatmul.mubr.bf16.vlgmr.msra.gmra.mrb[8].mxu0 %v5902_v6  ;;  %3353 = vmatmul.mubr.bf16.vlgmr.msra.gmra.mrb[20].mxu1 %v5902_v6 }
 0x40e   :  { %3362 = vmatpush1.bf16.msra.mxu0 %v4585_v5  ;;  %3393 = vmatprep.mubr.bf16.mxu0 %v5770_v17  ;;  %v4657_v5 = vld [vmem:[%s6181_s8 + $0x390] ss:$28 sps:$4 sm:$0xff]  }
 0x40f   :  { %4038 = vmatpush3.bf16.msra.mxu1 %v4589_v8  ;;  %3475 = vmatprep.mubr.bf16.mxu1 %v5770_v17  ;;  %v4599_v17 = vld [vmem:[%s6181_s8 + $0x88] ss:$28 sps:$4 sm:$0xff]   ;;  %v4660_v8 = vld [vmem:[%s6181_s8 + $0x558] ss:$28 sps:$4 sm:$0xff]  }
 0x410   :  { %3363 = vmatprep.subr.bf16.mxu0 %v4592_v9  ;;  %4039 = vmatprep.subr.bf16.mxu1 %v4593_v12  ;;  %v4663_v9 = vld [vmem:[%s6181_s8 + $0x3cc] ss:$28 sps:$4 sm:$0xff]  }
 0x411   :  { %v4661_v12 = vld [vmem:[%s6181_s8 + $0x3c8] ss:$28 sps:$4 sm:$0xff]  }
 0x412   :  { %3364 = vmatpush1.bf16.msra.mxu0 %v4590_v13  ;;  %v4666_v13 = vld [vmem:[%s6181_s8 + $0x404] ss:$28 sps:$4 sm:$0xff]  }
 0x413   :  { %4040 = vmatpush3.bf16.msra.mxu1 %v4594_v14  ;;  %3365 = vmatprep.subr.bf16.mxu0 %v4597_v15  ;;  %v4672_v14 = vld [vmem:[%s6181_s8 + $0x474] ss:$28 sps:$4 sm:$0xff]  }
 0x414   :  { %4041 = vmatprep.subr.bf16.mxu1 %v4598_v16  ;;  %v4670_v15 = vld [vmem:[%s6181_s8 + $0x470] ss:$28 sps:$4 sm:$0xff]  }
 0x415   :  { %v4675_v16 = vld [vmem:[%s6181_s8 + $0x4ac] ss:$28 sps:$4 sm:$0xff]  }
 0x416   :  { %3366 = vmatpush1.bf16.msra.mxu0 %v4595_v18  ;;  %v4673_v18 = vld [vmem:[%s6181_s8 + $0x4a8] ss:$28 sps:$4 sm:$0xff]  }
 0x417   :  { %4042 = vmatpush3.bf16.msra.mxu1 %v4599_v17  ;;  %3367 = vmatprep.subr.bf16.mxu0 %v4602_v19  ;;  %v4678_v17 = vld [vmem:[%s6181_s8 + $0x4e4] ss:$28 sps:$4 sm:$0xff]  }
 0x418   :  { %4043 = vmatprep.subr.bf16.mxu1 %v4603_v20  ;;  %v4676_v19 = vld [vmem:[%s6181_s8 + $0x4e0] ss:$28 sps:$4 sm:$0xff]  }
 0x419   :  { %v4681_v20 = vld [vmem:[%s6181_s8 + $0x51c] ss:$28 sps:$4 sm:$0xff]  }
 0x41a   :  { %3368 = vmatpush1.bf16.msra.mxu0 %v4600_v22  ;;  %v4679_v22 = vld [vmem:[%s6181_s8 + $0x518] ss:$28 sps:$4 sm:$0xff]  }
 0x41b   :  { %4044 = vmatpush3.bf16.msra.mxu1 %v4604_v23  ;;  %3369 = vmatprep.subr.bf16.mxu0 %v4607_v24  ;;  %v4684_v23 = vld [vmem:[%s6181_s8 + $0x554] ss:$28 sps:$4 sm:$0xff]  }
 0x41c   :  { %4045 = vmatprep.subr.bf16.mxu1 %v4608_v25  ;;  %v4682_v24 = vld [vmem:[%s6181_s8 + $0x550] ss:$28 sps:$4 sm:$0xff]   ;;  %v6144_v25 = vld [vmem:[%s6182_s9] sm:$0x7f] }
 0x41e   :  { %3370 = vmatpush1.bf16.msra.mxu0 %v4605_v26  ;;  %v2262_v26 = vrot.slane %v6144_v25, %v5506_v55 }
 0x41f   :  { %4046 = vmatpush3.bf16.msra.mxu1 %v4609_v27  ;;  %3371 = vmatprep.subr.bf16.mxu0 %v4612_v28  ;;  %v2270_v27 = vrot.slane %v6144_v25, %v5517_v10  ;;  %v2266_v28 = vrot.slane %v6144_v25, %v5512_v57 }
 0x420   :  { %4047 = vmatprep.subr.bf16.mxu1 %v4613_v29  ;;  %v2274_v29 = vrot.slane %v6144_v25, %v5520_v11 }
 0x422   :  { %3372 = vmatpush1.bf16.msra.mxu0 %v4610_v30 }
 0x423   :  { %4048 = vmatpush3.bf16.msra.mxu1 %v4614_v31  ;;  %3373 = vmatprep.subr.bf16.mxu0 %v4617_v32 }
 0x424   :  { %4049 = vmatprep.subr.bf16.mxu1 %v4618_v33 }
 0x426   :  { %3374 = vmatpush1.bf16.msra.mxu0 %v4615_v35 }
 0x427   :  { %4050 = vmatpush3.bf16.msra.mxu1 %v4619_v36  ;;  %3375 = vmatprep.subr.bf16.mxu0 %v4622_v37 }
 0x428   :  { %4051 = vmatprep.subr.bf16.mxu1 %v4623_v38 }
 0x42a   :  { %3376 = vmatpush1.bf16.msra.mxu0 %v4620_v39 }
 0x42b   :  { %4052 = vmatpush3.bf16.msra.mxu1 %v4624_v40  ;;  %3377 = vmatprep.subr.bf16.mxu0 %v4627_v41 }
 0x42c   :  { %3483 = vmatprep.subr.bf16.mxu1 %v4739_v2 }
 0x42e   :  { %3476 = vmatmul.mubr.bf16.vlgmr.msra.gmra.mrb[24].mxu1 %v5780_v21  ;;  %3378 = vmatpush1.bf16.msra.mxu0 %v4625_v42 }
 0x42f   :  { %3484 = vmatpush1.bf16.msra.mxu1 %v4628_v7  ;;  %4007 = vmatprep.mubr.msk.bf16.mxu1 %vm1251_vm0, %v5806_v34 }
 0x430   :  { %3379 = vmatprep.subr.bf16.mxu0 %v4631_v43  ;;  %3485 = vmatprep.subr.bf16.mxu1 %v4739_v2 }
 0x432   :  { %3380 = vmatpush1.bf16.msra.mxu0 %v4629_v44 }
 0x433   :  { %3486 = vmatpush1.bf16.msra.mxu1 %v4632_v45  ;;  %3381 = vmatprep.subr.bf16.mxu0 %v4635_v46 }
 0x434   :  { %3487 = vmatprep.subr.bf16.mxu1 %v4739_v2 }
 0x436   :  { %3382 = vmatpush1.bf16.msra.mxu0 %v4633_v47 }
 0x437   :  { %3488 = vmatpush1.bf16.msra.mxu1 %v4636_v48  ;;  %3383 = vmatprep.subr.bf16.mxu0 %v4639_v49 }
 0x438   :  { %3489 = vmatprep.subr.bf16.mxu1 %v4739_v2 }
 0x43a   :  { %3384 = vmatpush1.bf16.msra.mxu0 %v4637_v50 }
 0x43b   :  { %3490 = vmatpush1.bf16.msra.mxu1 %v4640_v51  ;;  %3385 = vmatprep.subr.bf16.mxu0 %v4643_v52 }
 0x43c   :  { %3491 = vmatprep.subr.bf16.mxu1 %v4739_v2 }
 0x43e   :  { %3386 = vmatpush1.bf16.msra.mxu0 %v4641_v53 }
 0x43f   :  { %3492 = vmatpush1.bf16.msra.mxu1 %v4644_v56  ;;  %3387 = vmatprep.subr.bf16.mxu0 %v4647_v58 }
 0x440   :  { %3493 = vmatprep.subr.bf16.mxu1 %v4739_v2 }
 0x442   :  { %3388 = vmatpush1.bf16.msra.mxu0 %v4645_v59 }
 0x443   :  { %3494 = vmatpush1.bf16.msra.mxu1 %v4648_v60  ;;  %3389 = vmatprep.subr.bf16.mxu0 %v4651_v61  ;;  %v2285_v61 = vsub.s32 6, %v5503_v54 }
 0x444   :  { %3495 = vmatprep.subr.bf16.mxu1 %v4739_v2 }
 0x446   :  { %3390 = vmatpush1.bf16.msra.mxu0 %v4649_v62  ;;  %v2286_v62 = vrot.slane %v6144_v25, %v2285_v61 }
 0x447   :  { %3496 = vmatpush1.bf16.msra.mxu1 %v4652_v63  ;;  %3391 = vmatprep.subr.bf16.mxu0 %v4655_v0 }
 0x448   :  { %3497 = vmatprep.subr.bf16.mxu1 %v4739_v2 }
 0x44a   :  { %3392 = vmatpush1.bf16.msra.mxu0 %v4653_v1 }
 0x44b   :  { %3498 = vmatpush1.bf16.msra.mxu1 %v4656_v3  ;;  %3402 = vmatprep.subr.bf16.mxu0 %v4659_v4 }
 0x44c   :  { %3499 = vmatprep.subr.bf16.mxu1 %v4739_v2  ;;  %v4664_v2 = vld [vmem:[%s6181_s8 + $0x400] ss:$28 sps:$4 sm:$0xff]  }
 0x44d   :  { %3394 = vmatmul.mubr.bf16.vlgmr.msra.gmra.mrb[12].mxu0 %v5780_v21  ;;  %v4669_v21 = vld [vmem:[%s6181_s8 + $0x43c] ss:$28 sps:$4 sm:$0xff]  }
 0x44e   :  { %3403 = vmatpush1.bf16.msra.mxu0 %v4657_v5  ;;  %4006 = vmatprep.mubr.msk.bf16.mxu0 %vm1251_vm0, %v5806_v34  ;;  %v4667_v34 = vld [vmem:[%s6181_s8 + $0x438] ss:$28 sps:$4 sm:$0xff]   ;;  %s4741_s8 = smov [#allocation2]  }
 0x44f   :  { %3500 = vmatpush1.bf16.msra.mxu1 %v4660_v8  ;;  %3404 = vmatprep.subr.bf16.mxu0 %v4663_v9  ;;  %s3580_s9 = sshll.u32 %s4741_s8, 4  ;;  %s3581_s9 = int_to_ptr.vmem [resolvable:$true] %s3580_s9 }
 0x450   :  { %s4715_s26 = scalar_lea.vmem %s3581_s9, 896  ;;  %p4720_p1 = scmp.lt.s32.totalorder %s3581_s9, %s3581_s9 }
 0x451   :  { %p4716_p0 = scmp.ne.s32.totalorder %s3581_s9, %s4715_s26  ;;  %p4721_p2 = scmp.lt.s32.totalorder %s4715_s26, %s4715_s26 }
 0x452   :  { %3516 = vmatmul.mubr.bf16.vlgmr.msra.gmra.mrb[28].mxu1 %v5902_v6  ;;  %3405 = vmatpush1.bf16.msra.mxu0 %v4661_v12 }
 0x453   :  { %3406 = vmatprep.subr.bf16.mxu0 %v4666_v13  ;;  %v2277_v13 = vsub.s32 4, %v5503_v54  ;;  %p4722_p3 = por %p4721_p2, %p4720_p1 }
 0x455   :  { %p4723_p4 = pnand %p4722_p3, %p4716_p0 }
 0x456   :  { %3407 = vmatpush1.bf16.msra.mxu0 %v4664_v2  ;;  %v2281_v2 = vsub.s32 5, %v5503_v54 }
 0x457   :  { %3408 = vmatprep.subr.bf16.mxu0 %v4669_v21 }
 0x45a   :  { %3409 = vmatpush1.bf16.msra.mxu0 %v4667_v34  ;;  %v2278_v34 = vrot.slane %v6144_v25, %v2277_v13 }
 0x45b   :  { %3410 = vmatprep.subr.bf16.mxu0 %v4672_v14  ;;  %v2282_v14 = vrot.slane %v6144_v25, %v2281_v2 }
 0x45e   :  { %3411 = vmatpush1.bf16.msra.mxu0 %v4670_v15 }
 0x45f   :  { %3412 = vmatprep.subr.bf16.mxu0 %v4675_v16 }
 0x462   :  { %3413 = vmatpush1.bf16.msra.mxu0 %v4673_v18 }
 0x463   :  { %3414 = vmatprep.subr.bf16.mxu0 %v4678_v17 }
 0x466   :  { %3415 = vmatpush1.bf16.msra.mxu0 %v4676_v19 }
 0x467   :  { %3416 = vmatprep.subr.bf16.mxu0 %v4681_v20 }
 0x46a   :  { %3417 = vmatpush1.bf16.msra.mxu0 %v4679_v22 }
 0x46b   :  { %3418 = vmatprep.subr.bf16.mxu0 %v4684_v23 }
 0x46e   :  { %3419 = vmatpush1.bf16.msra.mxu0 %v4682_v24 }
 0x471   :  { %3435 = vmatmul.mubr.bf16.vlgmr.msra.gmra.mrb[12].mxu0 %v5902_v6 }
 0x4e0   :  { %v3272_v30 = vpop.f32.mrb[8].mxu0  ;;  %v3354_v31 = vpop.f32.mrb[20].mxu1 }
 0x4e1   :  { %v4065_v6 = vadd.f32 %v3272_v30, %v2262_v26  ;;  %v4067_v32 = vadd.f32 %v3354_v31, %v2270_v27  ;;  %v3274_v33 = vpop.f32.mrb[9].mxu0  ;;  %v3356_v35 = vpop.f32.mrb[21].mxu1 }
 0x4e2   :  { %v4066_v36 = vadd.f32 %v3274_v33, %v2266_v28  ;;  %v4068_v37 = vadd.f32 %v3356_v35, %v2274_v29  ;;  %v3276_v38 = vpop.f32.mrb[10].mxu0  ;;  %v3358_v39 = vpop.f32.mrb[22].mxu1 }
 0x4e3   :  { %v4008_v55 = vmul.f32 -1.442695, %v4065_v6  ;;  %v4010_v40 = vmul.f32 -1.442695, %v4067_v32  ;;  %v3277_v41 = vpop.f32.mrb[11].mxu0  ;;  %v3359_v10 = vpop.f32.mrb[23].mxu1 }
 0x4e4   :  { %v4009_v42 = vmul.f32 -1.442695, %v4066_v36  ;;  %v4011_v7 = vmul.f32 -1.442695, %v4068_v37 }
 0x4e5   :  { %4687 = vpow2.f32 %v4008_v55 }
 0x4e6   :  { %4689 = vpow2.f32 %v4010_v40 }
 0x4e7   :  { %4691 = vpow2.f32 %v4009_v42 }
 0x4e8   :  { %4693 = vpow2.f32 %v4011_v7 }
 0x4ef   :  { %v4688_v57 = vpop.eup %4687 }
 0x4f0   :  { %v4690_v11 = vpop.eup %4689  ;;  %v3544_v43 = vadd.f32 1.0, %v4688_v57 }
 0x4f1   :  { %v4692_v44 = vpop.eup %4691  ;;  %v3546_v45 = vadd.f32 1.0, %v4690_v11 }
 0x4f2   :  { %v4694_v46 = vpop.eup %4693  ;;  %4695 = vrcp.f32 %v3544_v43  ;;  %v3545_v47 = vadd.f32 1.0, %v4692_v44 }
 0x4f3   :  { %4697 = vrcp.f32 %v3546_v45  ;;  %v3547_v48 = vadd.f32 1.0, %v4694_v46 }
 0x4f4   :  { %4699 = vrcp.f32 %v3545_v47 }
 0x4f5   :  { %4701 = vrcp.f32 %v3547_v48 }
 0x4fc   :  { %v4696_v49 = vpop.eup %4695 }
 0x4fd   :  { %v4698_v50 = vpop.eup %4697  ;;  %3565 = vst [vmem:[#allocation2] sm:$0xff] %v4696_v49 }
 0x4fe   :  { %v4700_v51 = vpop.eup %4699  ;;  %3567 = vst [vmem:[#allocation2 + $0x10] sm:$0xff] %v4698_v50 }
 0x4ff   :  { %v4702_v52 = vpop.eup %4701  ;;  %3566 = vst [vmem:[#allocation2 + $0x8] sm:$0xff] %v4700_v51 }
 0x500   :  { %3568 = vst [vmem:[#allocation2 + $0x18] sm:$0xff] %v4702_v52 }
 0x501   :  { %v4053_v53 = vpop.f32.mrb[24].mxu1 }
 0x502   :  { %v4054_v56 = vpop.f32.mrb[25].mxu1 }
 0x503   :  { %v4055_v58 = vadd.f32 %v4054_v56, %v4053_v53  ;;  %v4056_v59 = vpop.f32.mrb[26].mxu1 }
 0x504   :  { %v4057_v60 = vpop.f32.mrb[27].mxu1 }
 0x505   :  { %v3478_v63 = vadd.f32 %v4055_v58, %v2286_v62 }
 0x525   :  { %v3517_v0 = vpop.f32.mrb[28].mxu1 }
 0x526   :  { %v3518_v1 = vadd.f32 %v3517_v0, %v3478_v63  ;;  %v3519_v3 = vpop.f32.mrb[29].mxu1 }
 0x527   :  { %v3520_v4 = vpop.f32.mrb[30].mxu1 }
 0x528   :  { %v4014_v5 = vmul.f32 -1.442695, %v3518_v1  ;;  %v3521_v8 = vpop.f32.mrb[31].mxu1 }
 0x52a   :  { %4703 = vpow2.f32 %v4014_v5 }
 0x534   :  { %v4704_v9 = vpop.eup %4703 }
 0x535   :  { %v3550_v12 = vadd.f32 1.0, %v4704_v9 }
 0x537   :  { %4705 = vrcp.f32 %v3550_v12 }
 0x541   :  { %v4706_v21 = vpop.eup %4705 }
 0x542   :  { %3571 = vst.msk [vmem:[#allocation2 + $0x30] sm:$0xff] %vm1251_vm0, %v4706_v21 }
 0x544   :  { %v3436_v15 = vpop.f32.mrb[12].mxu0 }
 0x545   :  { %v4069_v16 = vadd.f32 %v3436_v15, %v2278_v34  ;;  %v3438_v18 = vpop.f32.mrb[13].mxu0 }
 0x546   :  { %v4070_v17 = vadd.f32 %v3438_v18, %v2282_v14  ;;  %v3440_v19 = vpop.f32.mrb[14].mxu0 }
 0x547   :  { %v4012_v20 = vmul.f32 -1.442695, %v4069_v16  ;;  %v3441_v22 = vpop.f32.mrb[15].mxu0 }
 0x548   :  { %v4013_v23 = vmul.f32 -1.442695, %v4070_v17 }
 0x549   :  { %4707 = vpow2.f32 %v4012_v20 }
 0x54a   :  { %4709 = vpow2.f32 %v4013_v23 }
 0x553   :  { %v4708_v24 = vpop.eup %4707 }
 0x554   :  { %v4710_v26 = vpop.eup %4709  ;;  %v3548_v54 = vadd.f32 1.0, %v4708_v24 }
 0x555   :  { %v3549_v27 = vadd.f32 1.0, %v4710_v26 }
 0x556   :  { %4711 = vrcp.f32 %v3548_v54 }
 0x557   :  { %4713 = vrcp.f32 %v3549_v27 }
 0x560   :  { %v4712_v28 = vpop.eup %4711 }
 0x561   :  { %v4714_v25 = vpop.eup %4713  ;;  %3569 = vst [vmem:[#allocation2 + $0x20] sm:$0xff] %v4712_v28 }
 0x562   :  { %3570 = vst [vmem:[#allocation2 + $0x28] sm:$0xff] %v4714_v25 }
 0x563   :  { %4726 = shalt.err (!%p4723_p4)
}
 0x564   :  { %s4727_s29 = scalar_lea.hbm %s6183_s10, 896 }
 0x565   :  { %p4728_p5 = scmp.ne.s32.totalorder %s6183_s10, %s4727_s29  ;;  %p4731_p6 = scmp.lt.u32.totalorder %s4727_s29, %s6183_s10 }
 0x567   :  { %p4733_p7 = pnand %p4731_p6, %p4728_p5 }
 0x569   :  { %4736 = shalt.err (!%p4733_p7)
}
 0x56a   :  { %3583 = dma.vmem_to_hbm [thread:$0]  %s3581_s9, 896, %s6183_s10, [#allocation3]  }
 0x56b   :  { %4737 = dma.done.wait [#allocation3], 896  }
 0x56c   :  { %4738 = vsyncadd [#allocation3], 4294966400 }
 0x56d   :  { %3591 = vsyncpa [#allocation3], 1 }

</bundles_post_ra>
